<compile_context>
chip_gen: v7x
topology: tpu7x:2x2x1
jax: 0.10.0
libtpu: 0.0.40
codegen_flags: <defaults>
</compile_context>

<pallas_src>
import math
import functools

import jax
import jax.numpy as jnp
import numpy as np
from jax.experimental import pallas as pl
from jax.experimental.pallas import tpu as pltpu

LN_EPS = 1e-5      # torch.nn.LayerNorm default eps
NEG_INF = -1e9     # matches scores.masked_fill(mask == 0, -1e9)


def _layernorm(x, gamma, beta):
    mean = jnp.mean(x, axis=-1, keepdims=True)
    var = jnp.mean((x - mean) ** 2, axis=-1, keepdims=True)
    return (x - mean) * jax.lax.rsqrt(var + LN_EPS) * gamma + beta


def _mask_to_bias(mask):
    """Float keep-mask (1=keep, 0=masked) -> bf16 additive bias (0 / -1e9).

    One broadcast add on the [H, tq, S] score slab instead of compare+select,
    and half the mask DMA bytes vs f32.  For rows with at least one kept key
    this is numerically identical to masked_fill(-1e9) after softmax.
    """
    return jnp.where(mask != 0.0, 0.0, NEG_INF).astype(jnp.bfloat16)


def _choose_row_tile(T, row_live_bytes, *, max_tile=512, slab_budget_bytes=16 << 20):
    """Largest q-tile that divides T, keeps the per-q-row live slab (attention
    scores / FFN hidden) under `slab_budget_bytes`, preferring lane-aligned
    multiples of 128, then multiples of 8."""
    cap = max(8, slab_budget_bytes // max(1, row_live_bytes))
    cap = min(cap, max_tile, T)
    if T <= cap:
        return T
    for t in range((cap // 128) * 128, 127, -128):
        if t > 0 and T % t == 0:
            return t
    for t in range((cap // 8) * 8, 7, -8):
        if t > 0 and T % t == 0:
            return t
    # TODO(synk): pad T to a 128-multiple instead of falling back to the full
    # extent when T has no suitable divisor.
    return T


def _compiler_params(est_vmem_bytes, *, q_carries_state):
    """dimension_semantics + per-generation VMEM limit derived from the tiles
    (defaults are only 16/32 MiB scoped; v6e has ~128 MiB physical, v7x 64)."""
    try:
        cap = int(pltpu.get_tpu_info().vmem_capacity_bytes)
    except Exception:
        cap = 64 << 20                       # v7x floor / interpret mode fallback
    limit = int(min(max(2 * int(est_vmem_bytes), 32 << 20), int(0.85 * cap)))
    sems = ("parallel", "arbitrary") if q_carries_state else ("parallel", "parallel")
    return pltpu.CompilerParams(dimension_semantics=sems, vmem_limit_bytes=limit)


def _attn_vmem_bytes(kv_len, tq, D, H):
    weights = 2 * (4 * D * D * 2 + 6 * D * 4)                       # bf16 mats + f32 biases/LN, double-buffered
    acts = 2 * (kv_len * D * 4 + tq * D * 4 + tq * kv_len * 2)      # x/mem block, out tile, bias tile
    scratch = 3 * kv_len * D * 2                                    # cached xn / K / V (bf16)
    slab = 2 * H * tq * kv_len * 4                                  # scores + probs (f32)
    return weights + acts + scratch + slab


def _ffn_vmem_bytes(tq, D, d_ff):
    weights = 2 * (2 * D * d_ff * 2 + (D + d_ff) * 4 + 2 * D * 4)
    acts = 2 * (2 * tq * D * 4)
    hidden = 2 * tq * d_ff * 4
    return weights + acts + hidden


# ---------------------------------------------------------------------------
# Shared multi-head attention core: all heads in one MXU contraction.
#   xn_q : [tq, D] bf16 (LayerNorm'd queries)
#   k, v : [S, D]  bf16 (cached per-batch projections)
#   bias : [tq, S] bf16 additive mask bias (0 / -1e9)
# ---------------------------------------------------------------------------
def _attn_core(xn_q, k, v, bias, wq, bq, wo, bo, *, num_heads):
    tq, d_model = xn_q.shape
    s = k.shape[0]
    dk = d_model // num_heads
    scale = 1.0 / math.sqrt(dk)

    q = (jnp.dot(xn_q, wq, preferred_element_type=jnp.float32) + bq) * scale
    qh = q.reshape(tq, num_heads, dk).astype(jnp.bfloat16)
    kh = k.reshape(s, num_heads, dk)
    vh = v.reshape(s, num_heads, dk)

    # All heads in one batched contraction: scores [H, tq, S].
    scores = jnp.einsum('thd,shd->hts', qh, kh,
                        preferred_element_type=jnp.float32)
    scores = scores + bias[None, :, :].astype(jnp.float32)

    # Softmax in f32 with an EXACT divide (approx reciprocal caused the
    # previous tolerance failure).
    # TODO(synk): for very long S, replace this full-S slab with a KV-chunked
    # online-softmax (flash) loop over the cached K/V scratch.
    s_max = jnp.max(scores, axis=-1, keepdims=True)
    p = jnp.exp(scores - s_max)
    p = p / jnp.sum(p, axis=-1, keepdims=True)

    ctx = jnp.einsum('hts,shd->thd', p.astype(jnp.bfloat16), vh,
                     preferred_element_type=jnp.float32)
    ctx = ctx.reshape(tq, d_model).astype(jnp.bfloat16)
    return jnp.dot(ctx, wo, preferred_element_type=jnp.float32) + bo


# ---------------------------------------------------------------------------
# Kernel 1: self-attention sublayer (LN -> MHA(q=k=v=norm(x)) -> residual).
# Grid = (B, T // tq); q axis is "arbitrary" so the per-batch LayerNorm / K /
# V caches in VMEM scratch persist across q-tiles (computed once at q == 0).
# ---------------------------------------------------------------------------
def _self_attn_sublayer_kernel(x_ref, bias_ref, gamma_ref, beta_ref,
                               wq_ref, bq_ref, wk_ref, bk_ref,
                               wv_ref, bv_ref, wo_ref, bo_ref,
                               o_ref, xn_scr, k_scr, v_scr, *, num_heads, tq):
    qi = pl.program_id(1)

    @pl.when(qi == 0)
    def _():
        xn = _layernorm(x_ref[0], gamma_ref[0], beta_ref[0]).astype(jnp.bfloat16)
        xn_scr[...] = xn
        k_scr[...] = (jnp.dot(xn, wk_ref[...],
                              preferred_element_type=jnp.float32)
                      + bk_ref[0]).astype(jnp.bfloat16)
        v_scr[...] = (jnp.dot(xn, wv_ref[...],
                              preferred_element_type=jnp.float32)
                      + bv_ref[0]).astype(jnp.bfloat16)

    q_start = pl.multiple_of(qi * tq, tq)
    x_q = x_ref[0, pl.ds(q_start, tq), :]        # [tq, D] f32 residual rows
    xn_q = xn_scr[pl.ds(q_start, tq), :]         # reuse cached LayerNorm rows

    out = _attn_core(xn_q, k_scr[...], v_scr[...], bias_ref[0],
                     wq_ref[...], bq_ref[0], wo_ref[...], bo_ref[0],
                     num_heads=num_heads)
    # TODO(synk): dropout omitted (inference / eval mode => identity).
    o_ref[0] = x_q + out


# ---------------------------------------------------------------------------
# Kernel 2: cross-attention sublayer (LN -> MHA(q=norm(x), k=v=memory) -> res).
# Memory K/V projections cached per batch at q == 0 (q axis "arbitrary").
# ---------------------------------------------------------------------------
def _cross_attn_sublayer_kernel(x_ref, mem_ref, bias_ref, gamma_ref, beta_ref,
                                wq_ref, bq_ref, wk_ref, bk_ref,
                                wv_ref, bv_ref, wo_ref, bo_ref,
                                o_ref, k_scr, v_scr, *, num_heads):
    @pl.when(pl.program_id(1) == 0)
    def _():
        mem = mem_ref[0]                         # [S, D] bf16
        k_scr[...] = (jnp.dot(mem, wk_ref[...],
                              preferred_element_type=jnp.float32)
                      + bk_ref[0]).astype(jnp.bfloat16)
        v_scr[...] = (jnp.dot(mem, wv_ref[...],
                              preferred_element_type=jnp.float32)
                      + bv_ref[0]).astype(jnp.bfloat16)

    x = x_ref[0]                                 # [tq, D] f32
    xn = _layernorm(x, gamma_ref[0], beta_ref[0]).astype(jnp.bfloat16)
    out = _attn_core(xn, k_scr[...], v_scr[...], bias_ref[0],
                     wq_ref[...], bq_ref[0], wo_ref[...], bo_ref[0],
                     num_heads=num_heads)
    o_ref[0] = x + out


# ---------------------------------------------------------------------------
# Kernel 3: position-wise FFN sublayer (LN -> W1/ReLU/W2 -> residual), q-tiled.
# ---------------------------------------------------------------------------
def _ffn_sublayer_kernel(x_ref, gamma_ref, beta_ref, w1_ref, b1_ref,
                         w2_ref, b2_ref, o_ref):
    x = x_ref[0]
    xn = _layernorm(x, gamma_ref[0], beta_ref[0]).astype(jnp.bfloat16)
    h = jnp.dot(xn, w1_ref[...], preferred_element_type=jnp.float32) + b1_ref[0]
    h = jnp.maximum(h, 0.0).astype(jnp.bfloat16)
    out = jnp.dot(h, w2_ref[...], preferred_element_type=jnp.float32) + b2_ref[0]
    o_ref[0] = x + out


# ---------------------------------------------------------------------------
# Wrappers
# ---------------------------------------------------------------------------
def _replicated(shape):
    # Whole-array block, same index for every grid step -> DMA'd once.
    # TODO(synk): single-buffer these via pipeline_mode=pl.Buffered(1) once the
    # target jax version's support is confirmed (halves weight VMEM on v7x).
    return pl.BlockSpec(shape, lambda b, q: (0,) * len(shape))


def self_attn_sublayer(x, bias, p, *, num_heads):
    B, T, D = x.shape
    tq = _choose_row_tile(T, 2 * num_heads * T * 4)
    nq = T // tq
    kernel = functools.partial(_self_attn_sublayer_kernel,
                               num_heads=num_heads, tq=tq)
    return pl.pallas_call(
        kernel,
        out_shape=jax.ShapeDtypeStruct((B, T, D), jnp.float32),
        grid=(B, nq),
        in_specs=[
            pl.BlockSpec((1, T, D), lambda b, q: (b, 0, 0)),    # full x (K/V + residual), const over q
            pl.BlockSpec((1, tq, T), lambda b, q: (b, q, 0)),   # additive mask bias q-tile (bf16)
            _replicated((1, D)), _replicated((1, D)),           # gamma, beta
            _replicated((D, D)), _replicated((1, D)),           # Wq (bf16), bq
            _replicated((D, D)), _replicated((1, D)),           # Wk, bk
            _replicated((D, D)), _replicated((1, D)),           # Wv, bv
            _replicated((D, D)), _replicated((1, D)),           # Wo, bo
        ],
        out_specs=pl.BlockSpec((1, tq, D), lambda b, q: (b, q, 0)),
        scratch_shapes=[
            pltpu.VMEM((T, D), jnp.bfloat16),   # cached LayerNorm(x)
            pltpu.VMEM((T, D), jnp.bfloat16),   # cached K
            pltpu.VMEM((T, D), jnp.bfloat16),   # cached V
        ],
        compiler_params=_compiler_params(_attn_vmem_bytes(T, tq, D, num_heads),
                                         q_carries_state=True),
    )(x, bias, p['gamma'], p['beta'], p['wq'], p['bq'], p['wk'], p['bk'],
      p['wv'], p['bv'], p['wo'], p['bo'])


def cross_attn_sublayer(x, memory_bf16, bias, p, *, num_heads):
    B, T, D = x.shape
    S = memory_bf16.shape[1]
    tq = _choose_row_tile(T, 2 * num_heads * S * 4)
    nq = T // tq
    kernel = functools.partial(_cross_attn_sublayer_kernel, num_heads=num_heads)
    return pl.pallas_call(
        kernel,
        out_shape=jax.ShapeDtypeStruct((B, T, D), jnp.float32),
        grid=(B, nq),
        in_specs=[
            pl.BlockSpec((1, tq, D), lambda b, q: (b, q, 0)),   # x q-tile
            pl.BlockSpec((1, S, D), lambda b, q: (b, 0, 0)),    # memory (bf16), const over q
            pl.BlockSpec((1, tq, S), lambda b, q: (b, q, 0)),   # additive mask bias q-tile (bf16)
            _replicated((1, D)), _replicated((1, D)),           # gamma, beta
            _replicated((D, D)), _replicated((1, D)),           # Wq, bq
            _replicated((D, D)), _replicated((1, D)),           # Wk, bk
            _replicated((D, D)), _replicated((1, D)),           # Wv, bv
            _replicated((D, D)), _replicated((1, D)),           # Wo, bo
        ],
        out_specs=pl.BlockSpec((1, tq, D), lambda b, q: (b, q, 0)),
        scratch_shapes=[
            pltpu.VMEM((S, D), jnp.bfloat16),   # cached K(memory)
            pltpu.VMEM((S, D), jnp.bfloat16),   # cached V(memory)
        ],
        compiler_params=_compiler_params(_attn_vmem_bytes(S, tq, D, num_heads),
                                         q_carries_state=True),
    )(x, memory_bf16, bias, p['gamma'], p['beta'], p['wq'], p['bq'], p['wk'],
      p['bk'], p['wv'], p['bv'], p['wo'], p['bo'])


def ffn_sublayer(x, p):
    B, T, D = x.shape
    d_ff = p['w1'].shape[1]
    tq = _choose_row_tile(T, 2 * d_ff * 4)
    nq = T // tq
    return pl.pallas_call(
        _ffn_sublayer_kernel,
        out_shape=jax.ShapeDtypeStruct((B, T, D), jnp.float32),
        grid=(B, nq),
        in_specs=[
            pl.BlockSpec((1, tq, D), lambda b, q: (b, q, 0)),
            _replicated((1, D)), _replicated((1, D)),           # gamma, beta
            _replicated((D, d_ff)), _replicated((1, d_ff)),     # W1 (bf16), b1
            _replicated((d_ff, D)), _replicated((1, D)),        # W2 (bf16), b2
        ],
        out_specs=pl.BlockSpec((1, tq, D), lambda b, q: (b, q, 0)),
        compiler_params=_compiler_params(_ffn_vmem_bytes(tq, D, d_ff),
                                         q_carries_state=False),
    )(x, p['gamma'], p['beta'], p['w1'], p['b1'], p['w2'], p['b2'])


def _cast_weights_bf16(p, names):
    q = dict(p)
    for n in names:
        q[n] = p[n].astype(jnp.bfloat16)
    return q


def decoder_layer_forward(x, memory, src_mask, trg_mask, params, *, num_heads):
    """DecoderLayer.forward:
       x = x + self_attn(norm(x), norm(x), norm(x), trg_mask)
       x = x + src_attn(norm(x), memory,  memory,  src_mask)
       x = x + feed_forward(norm(x))
    """
    # TODO(synk): fuse cross-attn + FFN (or all three) into one pallas_call to
    # cut the f32 residual's HBM round-trips (matters most on v5e).
    p_self = _cast_weights_bf16(params['self_attn'], ['wq', 'wk', 'wv', 'wo'])
    p_src = _cast_weights_bf16(params['src_attn'], ['wq', 'wk', 'wv', 'wo'])
    p_ff = _cast_weights_bf16(params['ff'], ['w1', 'w2'])
    mem_bf16 = memory.astype(jnp.bfloat16)     # halves the K/V-source DMA
    trg_bias = _mask_to_bias(trg_mask)
    src_bias = _mask_to_bias(src_mask)

    x = self_attn_sublayer(x, trg_bias, p_self, num_heads=num_heads)
    x = cross_attn_sublayer(x, mem_bf16, src_bias, p_src, num_heads=num_heads)
    return ffn_sublayer(x, p_ff)


# ---------------------------------------------------------------------------
# Pure-JAX reference mirroring the kernel arithmetic op-for-op (bf16 matmul
# operands, f32 accumulation; f32 LN / softmax / residuals; additive bias).
# ---------------------------------------------------------------------------
def _ref_attn_sublayer(x, kv, bias, p, num_heads, ln_kv):
    bf = jnp.bfloat16
    B, T, D = x.shape
    dk = D // num_heads
    scale = 1.0 / math.sqrt(dk)
    xn = _layernorm(x, p['gamma'][0], p['beta'][0]).astype(bf)
    kv_in = (_layernorm(kv, p['gamma'][0], p['beta'][0]).astype(bf)
             if ln_kv else kv.astype(bf))
    q = (jnp.einsum('btd,df->btf', xn, p['wq'].astype(bf),
                    preferred_element_type=jnp.float32) + p['bq'][0]) * scale
    k = (jnp.einsum('bsd,df->bsf', kv_in, p['wk'].astype(bf),
                    preferred_element_type=jnp.float32) + p['bk'][0]).astype(bf)
    v = (jnp.einsum('bsd,df->bsf', kv_in, p['wv'].astype(bf),
                    preferred_element_type=jnp.float32) + p['bv'][0]).astype(bf)
    S = k.shape[1]
    qh = q.reshape(B, T, num_heads, dk).astype(bf)
    kh = k.reshape(B, S, num_heads, dk)
    vh = v.reshape(B, S, num_heads, dk)
    scores = jnp.einsum('bthd,bshd->bhts', qh, kh,
                        preferred_element_type=jnp.float32)
    scores = scores + bias[:, None, :, :].astype(jnp.float32)
    s_max = jnp.max(scores, axis=-1, keepdims=True)
    pr = jnp.exp(scores - s_max)
    pr = pr / jnp.sum(pr, axis=-1, keepdims=True)
    ctx = jnp.einsum('bhts,bshd->bthd', pr.astype(bf), vh,
                     preferred_element_type=jnp.float32).reshape(B, T, D)
    out = jnp.einsum('btd,df->btf', ctx.astype(bf), p['wo'].astype(bf),
                     preferred_element_type=jnp.float32) + p['bo'][0]
    return x + out


def _ref_ffn_sublayer(x, p):
    bf = jnp.bfloat16
    xn = _layernorm(x, p['gamma'][0], p['beta'][0])
    h = jnp.einsum('btd,df->btf', xn.astype(bf), p['w1'].astype(bf),
                   preferred_element_type=jnp.float32) + p['b1'][0]
    h = jnp.maximum(h, 0.0)
    out = jnp.einsum('btf,fd->btd', h.astype(bf), p['w2'].astype(bf),
                     preferred_element_type=jnp.float32) + p['b2'][0]
    return x + out


def _ref_decoder_layer(x, memory, src_mask, trg_mask, params, num_heads):
    trg_bias = _mask_to_bias(trg_mask)
    src_bias = _mask_to_bias(src_mask)
    x = _ref_attn_sublayer(x, x, trg_bias, params['self_attn'], num_heads, True)
    x = _ref_attn_sublayer(x, memory, src_bias, params['src_attn'], num_heads, False)
    return _ref_ffn_sublayer(x, params['ff'])


# ---------------------------------------------------------------------------
# Deterministic parameter init (synthetic; weights stored as [in, out])
# ---------------------------------------------------------------------------
def _init_attn_params(key, d_model):
    ks = jax.random.split(key, 8)
    def lin(k, fi, fo):
        return jax.random.normal(k, (fi, fo), jnp.float32) / math.sqrt(fi)
    return {
        'gamma': jnp.ones((1, d_model), jnp.float32),
        'beta': jnp.zeros((1, d_model), jnp.float32),
        'wq': lin(ks[0], d_model, d_model), 'bq': 0.01 * jax.random.normal(ks[1], (1, d_model), jnp.float32),
        'wk': lin(ks[2], d_model, d_model), 'bk': 0.01 * jax.random.normal(ks[3], (1, d_model), jnp.float32),
        'wv': lin(ks[4], d_model, d_model), 'bv': 0.01 * jax.random.normal(ks[5], (1, d_model), jnp.float32),
        'wo': lin(ks[6], d_model, d_model), 'bo': 0.01 * jax.random.normal(ks[7], (1, d_model), jnp.float32),
    }


def _init_ff_params(key, d_model, d_ff):
    ks = jax.random.split(key, 4)
    return {
        'gamma': jnp.ones((1, d_model), jnp.float32),
        'beta': jnp.zeros((1, d_model), jnp.float32),
        'w1': jax.random.normal(ks[0], (d_model, d_ff), jnp.float32) / math.sqrt(d_model),
        'b1': 0.01 * jax.random.normal(ks[1], (1, d_ff), jnp.float32),
        'w2': jax.random.normal(ks[2], (d_ff, d_model), jnp.float32) / math.sqrt(d_ff),
        'b2': 0.01 * jax.random.normal(ks[3], (1, d_model), jnp.float32),
    }


if __name__ == "__main__":
    B, T, S, D, H, D_FF = 2, 8, 8, 32, 4, 64

    root = jax.random.PRNGKey(0)
    k_x, k_m, k_sa, k_ca, k_ff = jax.random.split(root, 5)

    x = jax.random.normal(k_x, (B, T, D), jnp.float32)
    memory = jax.random.normal(k_m, (B, S, D), jnp.float32)

    # causal target mask [B, T, T]; src mask [B, T, S] with one masked key in batch 1
    trg_mask = jnp.broadcast_to(jnp.tril(jnp.ones((T, T), jnp.float32)), (B, T, T))
    src_mask = jnp.ones((B, T, S), jnp.float32).at[1, :, S - 1].set(0.0)

    params = {
        'self_attn': _init_attn_params(k_sa, D),
        'src_attn': _init_attn_params(k_ca, D),
        'ff': _init_ff_params(k_ff, D, D_FF),
    }

    out = decoder_layer_forward(x, memory, src_mask, trg_mask, params, num_heads=H)
    out = jax.block_until_ready(out)

    ref = _ref_decoder_layer(x, memory, src_mask, trg_mask, params, H)
    # bf16 MXU operands mean isolated 1-bf16-ulp (~0.8% relative) flips from
    # accumulation-order differences can propagate through three sublayers;
    # 2e-2 bounds that while structural errors would be O(1).
    np.testing.assert_allclose(np.asarray(out), np.asarray(ref),
                               atol=2e-2, rtol=2e-2)

    print("KERNEL_OK")
</pallas_src>

<mosaic_0001>
module attributes {stable_mosaic.version = 11 : i64} {
  func.func @_self_attn_sublayer_kernel(%arg0: i32, %arg1: i32, %arg2: memref<1x8x32xf32, #tpu.memory_space<vmem>>, %arg3: memref<1x8x8xbf16, #tpu.memory_space<vmem>>, %arg4: memref<1x32xf32, #tpu.memory_space<vmem>>, %arg5: memref<1x32xf32, #tpu.memory_space<vmem>>, %arg6: memref<32x32xbf16, #tpu.memory_space<vmem>>, %arg7: memref<1x32xf32, #tpu.memory_space<vmem>>, %arg8: memref<32x32xbf16, #tpu.memory_space<vmem>>, %arg9: memref<1x32xf32, #tpu.memory_space<vmem>>, %arg10: memref<32x32xbf16, #tpu.memory_space<vmem>>, %arg11: memref<1x32xf32, #tpu.memory_space<vmem>>, %arg12: memref<32x32xbf16, #tpu.memory_space<vmem>>, %arg13: memref<1x32xf32, #tpu.memory_space<vmem>>, %arg14: memref<1x8x32xf32, #tpu.memory_space<vmem>>, %arg15: memref<8x32xbf16, #tpu.memory_space<vmem>>, %arg16: memref<8x32xbf16, #tpu.memory_space<vmem>>, %arg17: memref<8x32xbf16, #tpu.memory_space<vmem>>) attributes {dimension_semantics = [#tpu.dimension_semantics<parallel>, #tpu.dimension_semantics<arbitrary>], iteration_bounds = array<i64: 2, 1>, scalar_prefetch = 0 : i64, scratch_operands = 3 : i64, tpu.core_type = #tpu.core_type<tc>, window_params = [{transform_indices = @transform_0, window_bounds = array<i64: 1, 8, 32>}, {transform_indices = @transform_1, window_bounds = array<i64: 1, 8, 8>}, {pipeline_mode = #tpu.pipeline_mode<synchronous>, transform_indices = @transform_2, window_bounds = array<i64: 1, 32>}, {pipeline_mode = #tpu.pipeline_mode<synchronous>, transform_indices = @transform_3, window_bounds = array<i64: 1, 32>}, {pipeline_mode = #tpu.pipeline_mode<synchronous>, transform_indices = @transform_4, window_bounds = array<i64: 32, 32>}, {pipeline_mode = #tpu.pipeline_mode<synchronous>, transform_indices = @transform_5, window_bounds = array<i64: 1, 32>}, {pipeline_mode = #tpu.pipeline_mode<synchronous>, transform_indices = @transform_6, window_bounds = array<i64: 32, 32>}, {pipeline_mode = #tpu.pipeline_mode<synchronous>, transform_indices = @transform_7, window_bounds = array<i64: 1, 32>}, {pipeline_mode = #tpu.pipeline_mode<synchronous>, transform_indices = @transform_8, window_bounds = array<i64: 32, 32>}, {pipeline_mode = #tpu.pipeline_mode<synchronous>, transform_indices = @transform_9, window_bounds = array<i64: 1, 32>}, {pipeline_mode = #tpu.pipeline_mode<synchronous>, transform_indices = @transform_10, window_bounds = array<i64: 32, 32>}, {pipeline_mode = #tpu.pipeline_mode<synchronous>, transform_indices = @transform_11, window_bounds = array<i64: 1, 32>}, {transform_indices = @transform_12, window_bounds = array<i64: 1, 8, 32>}]} {
    %c0_i32 = arith.constant 0 : i32
    %0 = arith.cmpi eq, %arg1, %c0_i32 : i32
    %1 = arith.extui %0 : i1 to i32
    %c0_i32_0 = arith.constant 0 : i32
    %2 = arith.cmpi ne, %1, %c0_i32_0 : i32
    scf.if %2 {
      %c0_27 = arith.constant 0 : index
      %c0_28 = arith.constant 0 : index
      %c0_29 = arith.constant 0 : index
      %57 = vector.load %arg2[%c0_27, %c0_28, %c0_29] : memref<1x8x32xf32, #tpu.memory_space<vmem>>, vector<1x8x32xf32>
      %58 = vector.shape_cast %57 : vector<1x8x32xf32> to vector<8x32xf32>
      %c0_30 = arith.constant 0 : index
      %c0_31 = arith.constant 0 : index
      %59 = vector.load %arg4[%c0_30, %c0_31] : memref<1x32xf32, #tpu.memory_space<vmem>>, vector<1x32xf32>
      %60 = vector.shape_cast %59 : vector<1x32xf32> to vector<32xf32>
      %c0_32 = arith.constant 0 : index
      %c0_33 = arith.constant 0 : index
      %61 = vector.load %arg5[%c0_32, %c0_33] : memref<1x32xf32, #tpu.memory_space<vmem>>, vector<1x32xf32>
      %62 = vector.shape_cast %61 : vector<1x32xf32> to vector<32xf32>
      %cst_34 = arith.constant dense<0.000000e+00> : vector<8xf32>
      %63 = vector.multi_reduction <add>, %58, %cst_34 [1] : vector<8x32xf32> to vector<8xf32>
      %64 = vector.shape_cast %63 : vector<8xf32> to vector<8x1xf32>
      %cst_35 = arith.constant 3.200000e+01 : f32
      %65 = vector.broadcast %cst_35 : f32 to vector<8x1xf32>
      %66 = arith.divf %64, %65 : vector<8x1xf32>
      %67 = vector.broadcast %66 : vector<8x1xf32> to vector<8x32xf32>
      %68 = arith.subf %58, %67 : vector<8x32xf32>
      %69 = arith.mulf %68, %68 : vector<8x32xf32>
      %cst_36 = arith.constant dense<0.000000e+00> : vector<8xf32>
      %70 = vector.multi_reduction <add>, %69, %cst_36 [1] : vector<8x32xf32> to vector<8xf32>
      %71 = vector.shape_cast %70 : vector<8xf32> to vector<8x1xf32>
      %cst_37 = arith.constant 3.200000e+01 : f32
      %72 = vector.broadcast %cst_37 : f32 to vector<8x1xf32>
      %73 = arith.divf %71, %72 : vector<8x1xf32>
      %74 = vector.broadcast %66 : vector<8x1xf32> to vector<8x32xf32>
      %75 = arith.subf %58, %74 : vector<8x32xf32>
      %cst_38 = arith.constant 9.99999974E-6 : f32
      %76 = vector.broadcast %cst_38 : f32 to vector<8x1xf32>
      %77 = arith.addf %73, %76 : vector<8x1xf32>
      %78 = math.rsqrt %77 : vector<8x1xf32>
      %79 = vector.broadcast %78 : vector<8x1xf32> to vector<8x32xf32>
      %80 = arith.mulf %75, %79 : vector<8x32xf32>
      %81 = vector.shape_cast %60 : vector<32xf32> to vector<1x32xf32>
      %82 = vector.broadcast %81 : vector<1x32xf32> to vector<8x32xf32>
      %83 = arith.mulf %80, %82 : vector<8x32xf32>
      %84 = vector.shape_cast %62 : vector<32xf32> to vector<1x32xf32>
      %85 = vector.broadcast %84 : vector<1x32xf32> to vector<8x32xf32>
      %86 = arith.addf %83, %85 : vector<8x32xf32>
      %87 = arith.truncf %86 : vector<8x32xf32> to vector<8x32xbf16>
      %c0_39 = arith.constant 0 : index
      %c0_40 = arith.constant 0 : index
      %88 = vector.load %arg15[%c0_39, %c0_40] : memref<8x32xbf16, #tpu.memory_space<vmem>>, vector<8x32xbf16>
      tpu.vector_store %arg15[%c0_39, %c0_40], %87 {strides = array<i32>} : memref<8x32xbf16, #tpu.memory_space<vmem>>, vector<8x32xbf16>,
      %c0_41 = arith.constant 0 : index
      %c0_42 = arith.constant 0 : index
      %89 = vector.load %arg8[%c0_41, %c0_42] : memref<32x32xbf16, #tpu.memory_space<vmem>>, vector<32x32xbf16>
      %cst_43 = arith.constant dense<0.000000e+00> : vector<8x32xf32>
      %90 = tpu.matmul %87, %89, %cst_43 {dimension_numbers = #tpu.dot_dimension_numbers<[1], [0], [0], [1], [0, 0, 1, 1], [], []>} : vector<8x32xbf16>, vector<32x32xbf16>, vector<8x32xf32> -> vector<8x32xf32>
      %c0_44 = arith.constant 0 : index
      %c0_45 = arith.constant 0 : index
      %91 = vector.load %arg9[%c0_44, %c0_45] : memref<1x32xf32, #tpu.memory_space<vmem>>, vector<1x32xf32>
      %92 = vector.shape_cast %91 : vector<1x32xf32> to vector<32xf32>
      %93 = vector.shape_cast %92 : vector<32xf32> to vector<1x32xf32>
      %94 = vector.broadcast %93 : vector<1x32xf32> to vector<8x32xf32>
      %95 = arith.addf %90, %94 : vector<8x32xf32>
      %96 = arith.truncf %95 : vector<8x32xf32> to vector<8x32xbf16>
      %c0_46 = arith.constant 0 : index
      %c0_47 = arith.constant 0 : index
      %97 = vector.load %arg16[%c0_46, %c0_47] : memref<8x32xbf16, #tpu.memory_space<vmem>>, vector<8x32xbf16>
      tpu.vector_store %arg16[%c0_46, %c0_47], %96 {strides = array<i32>} : memref<8x32xbf16, #tpu.memory_space<vmem>>, vector<8x32xbf16>,
      %c0_48 = arith.constant 0 : index
      %c0_49 = arith.constant 0 : index
      %98 = vector.load %arg10[%c0_48, %c0_49] : memref<32x32xbf16, #tpu.memory_space<vmem>>, vector<32x32xbf16>
      %cst_50 = arith.constant dense<0.000000e+00> : vector<8x32xf32>
      %99 = tpu.matmul %87, %98, %cst_50 {dimension_numbers = #tpu.dot_dimension_numbers<[1], [0], [0], [1], [0, 0, 1, 1], [], []>} : vector<8x32xbf16>, vector<32x32xbf16>, vector<8x32xf32> -> vector<8x32xf32>
      %c0_51 = arith.constant 0 : index
      %c0_52 = arith.constant 0 : index
      %100 = vector.load %arg11[%c0_51, %c0_52] : memref<1x32xf32, #tpu.memory_space<vmem>>, vector<1x32xf32>
      %101 = vector.shape_cast %100 : vector<1x32xf32> to vector<32xf32>
      %102 = vector.shape_cast %101 : vector<32xf32> to vector<1x32xf32>
      %103 = vector.broadcast %102 : vector<1x32xf32> to vector<8x32xf32>
      %104 = arith.addf %99, %103 : vector<8x32xf32>
      %105 = arith.truncf %104 : vector<8x32xf32> to vector<8x32xbf16>
      %c0_53 = arith.constant 0 : index
      %c0_54 = arith.constant 0 : index
      %106 = vector.load %arg17[%c0_53, %c0_54] : memref<8x32xbf16, #tpu.memory_space<vmem>>, vector<8x32xbf16>
      tpu.vector_store %arg17[%c0_53, %c0_54], %105 {strides = array<i32>} : memref<8x32xbf16, #tpu.memory_space<vmem>>, vector<8x32xbf16>,
    } else {
    }
    %c8_i32 = arith.constant 8 : i32
    %3 = arith.muli %arg1, %c8_i32 : i32
    %4 = tpu.assume_multiple %3, 8 : i32
    %c0 = arith.constant 0 : index
    %5 = arith.index_cast %4 : i32 to index
    %c0_1 = arith.constant 0 : index
    %6 = vector.load %arg2[%c0, %5, %c0_1] : memref<1x8x32xf32, #tpu.memory_space<vmem>>, vector<1x8x32xf32>
    %7 = vector.shape_cast %6 : vector<1x8x32xf32> to vector<8x32xf32>
    %8 = arith.index_cast %4 : i32 to index
    %c0_2 = arith.constant 0 : index
    %9 = vector.load %arg15[%8, %c0_2] : memref<8x32xbf16, #tpu.memory_space<vmem>>, vector<8x32xbf16>
    %c0_3 = arith.constant 0 : index
    %c0_4 = arith.constant 0 : index
    %10 = vector.load %arg16[%c0_3, %c0_4] : memref<8x32xbf16, #tpu.memory_space<vmem>>, vector<8x32xbf16>
    %c0_5 = arith.constant 0 : index
    %c0_6 = arith.constant 0 : index
    %11 = vector.load %arg17[%c0_5, %c0_6] : memref<8x32xbf16, #tpu.memory_space<vmem>>, vector<8x32xbf16>
    %c0_7 = arith.constant 0 : index
    %c0_8 = arith.constant 0 : index
    %c0_9 = arith.constant 0 : index
    %12 = vector.load %arg3[%c0_7, %c0_8, %c0_9] : memref<1x8x8xbf16, #tpu.memory_space<vmem>>, vector<1x8x8xbf16>
    %13 = vector.shape_cast %12 : vector<1x8x8xbf16> to vector<8x8xbf16>
    %c0_10 = arith.constant 0 : index
    %c0_11 = arith.constant 0 : index
    %14 = vector.load %arg6[%c0_10, %c0_11] : memref<32x32xbf16, #tpu.memory_space<vmem>>, vector<32x32xbf16>
    %c0_12 = arith.constant 0 : index
    %c0_13 = arith.constant 0 : index
    %15 = vector.load %arg7[%c0_12, %c0_13] : memref<1x32xf32, #tpu.memory_space<vmem>>, vector<1x32xf32>
    %16 = vector.shape_cast %15 : vector<1x32xf32> to vector<32xf32>
    %c0_14 = arith.constant 0 : index
    %c0_15 = arith.constant 0 : index
    %17 = vector.load %arg12[%c0_14, %c0_15] : memref<32x32xbf16, #tpu.memory_space<vmem>>, vector<32x32xbf16>
    %c0_16 = arith.constant 0 : index
    %c0_17 = arith.constant 0 : index
    %18 = vector.load %arg13[%c0_16, %c0_17] : memref<1x32xf32, #tpu.memory_space<vmem>>, vector<1x32xf32>
    %19 = vector.shape_cast %18 : vector<1x32xf32> to vector<32xf32>
    %cst = arith.constant dense<0.000000e+00> : vector<8x32xf32>
    %20 = tpu.matmul %9, %14, %cst {dimension_numbers = #tpu.dot_dimension_numbers<[1], [0], [0], [1], [0, 0, 1, 1], [], []>} : vector<8x32xbf16>, vector<32x32xbf16>, vector<8x32xf32> -> vector<8x32xf32>
    %21 = vector.shape_cast %16 : vector<32xf32> to vector<1x32xf32>
    %22 = vector.broadcast %21 : vector<1x32xf32> to vector<8x32xf32>
    %23 = arith.addf %20, %22 : vector<8x32xf32>
    %cst_18 = arith.constant 0.353553385 : f32
    %24 = vector.broadcast %cst_18 : f32 to vector<8x32xf32>
    %25 = arith.mulf %23, %24 : vector<8x32xf32>
    %26 = vector.shape_cast %25 : vector<8x32xf32> to vector<8x4x8xf32>
    %27 = arith.truncf %26 : vector<8x4x8xf32> to vector<8x4x8xbf16>
    %28 = vector.shape_cast %10 : vector<8x32xbf16> to vector<8x4x8xbf16>
    %29 = vector.shape_cast %11 : vector<8x32xbf16> to vector<8x4x8xbf16>
    "tpu.trace_start"() <{level = 10 : i32, message = "thd,shd->hts"}> : () -> ()
    %cst_19 = arith.constant dense<0.000000e+00> : vector<4x8x8xf32>
    %30 = tpu.matmul %27, %28, %cst_19 {dimension_numbers = #tpu.dot_dimension_numbers<[2], [2], [0], [0], [0, 1, 0, 0, 1, 0], [1], [1]>} : vector<8x4x8xbf16>, vector<8x4x8xbf16>, vector<4x8x8xf32> -> vector<4x8x8xf32>
    "tpu.trace_stop"() : () -> ()
    %31 = vector.shape_cast %13 : vector<8x8xbf16> to vector<1x8x8xbf16>
    %32 = arith.extf %31 : vector<1x8x8xbf16> to vector<1x8x8xf32>
    %33 = vector.broadcast %32 : vector<1x8x8xf32> to vector<4x8x8xf32>
    %34 = arith.addf %30, %33 : vector<4x8x8xf32>
    %cst_20 = arith.constant dense<0xFF800000> : vector<4x8xf32>
    %35 = vector.multi_reduction <maximumf>, %34, %cst_20 [2] : vector<4x8x8xf32> to vector<4x8xf32>
    %36 = vector.shape_cast %35 : vector<4x8xf32> to vector<4x8x1xf32>
    %37 = vector.broadcast %36 : vector<4x8x1xf32> to vector<4x8x8xf32>
    %38 = arith.subf %34, %37 : vector<4x8x8xf32>
    %39 = math.exp %38 : vector<4x8x8xf32>
    %cst_21 = arith.constant dense<0.000000e+00> : vector<4x8xf32>
    %40 = vector.multi_reduction <add>, %39, %cst_21 [2] : vector<4x8x8xf32> to vector<4x8xf32>
    %41 = vector.shape_cast %40 : vector<4x8xf32> to vector<4x8x1xf32>
    %42 = vector.broadcast %41 : vector<4x8x1xf32> to vector<4x8x8xf32>
    %43 = arith.divf %39, %42 : vector<4x8x8xf32>
    %44 = arith.truncf %43 : vector<4x8x8xf32> to vector<4x8x8xbf16>
    "tpu.trace_start"() <{level = 10 : i32, message = "hts,shd->thd"}> : () -> ()
    %cst_22 = arith.constant dense<0.000000e+00> : vector<4x8x8xf32>
    %45 = tpu.matmul %29, %44, %cst_22 {dimension_numbers = #tpu.dot_dimension_numbers<[0], [2], [2], [1], [0, 1, 0, 2, 1, 1], [1], [0]>} : vector<8x4x8xbf16>, vector<4x8x8xbf16>, vector<4x8x8xf32> -> vector<4x8x8xf32>
    %46 = tpu.transpose %45, [2, 0, 1] : vector<4x8x8xf32> -> vector<8x4x8xf32>
    "tpu.trace_stop"() : () -> ()
    %47 = vector.shape_cast %46 : vector<8x4x8xf32> to vector<8x32xf32>
    %48 = arith.truncf %47 : vector<8x32xf32> to vector<8x32xbf16>
    %cst_23 = arith.constant dense<0.000000e+00> : vector<8x32xf32>
    %49 = tpu.matmul %48, %17, %cst_23 {dimension_numbers = #tpu.dot_dimension_numbers<[1], [0], [0], [1], [0, 0, 1, 1], [], []>} : vector<8x32xbf16>, vector<32x32xbf16>, vector<8x32xf32> -> vector<8x32xf32>
    %50 = vector.shape_cast %19 : vector<32xf32> to vector<1x32xf32>
    %51 = vector.broadcast %50 : vector<1x32xf32> to vector<8x32xf32>
    %52 = arith.addf %49, %51 : vector<8x32xf32>
    %53 = arith.addf %7, %52 : vector<8x32xf32>
    %c0_24 = arith.constant 0 : index
    %c0_25 = arith.constant 0 : index
    %c0_26 = arith.constant 0 : index
    %54 = vector.load %arg14[%c0_24, %c0_25, %c0_26] : memref<1x8x32xf32, #tpu.memory_space<vmem>>, vector<1x8x32xf32>
    %55 = vector.shape_cast %54 : vector<1x8x32xf32> to vector<8x32xf32>
    %56 = vector.shape_cast %53 : vector<8x32xf32> to vector<1x8x32xf32>
    tpu.vector_store %arg14[%c0_24, %c0_25, %c0_26], %56 {strides = array<i32>} : memref<1x8x32xf32, #tpu.memory_space<vmem>>, vector<1x8x32xf32>,
    return
  }
  func.func @transform_0(%arg0: i32, %arg1: i32) -> (i32, i32, i32) {
    %c0_i32 = arith.constant 0 : i32
    %c0_i32_0 = arith.constant 0 : i32
    %c0_i32_1 = arith.constant 0 : i32
    return %arg0, %c0_i32, %c0_i32_0 : i32, i32, i32
  }
  func.func @transform_1(%arg0: i32, %arg1: i32) -> (i32, i32, i32) {
    %c0_i32 = arith.constant 0 : i32
    %c0_i32_0 = arith.constant 0 : i32
    return %arg0, %arg1, %c0_i32 : i32, i32, i32
  }
  func.func @transform_2(%arg0: i32, %arg1: i32) -> (i32, i32) {
    %c0_i32 = arith.constant 0 : i32
    %c0_i32_0 = arith.constant 0 : i32
    %c0_i32_1 = arith.constant 0 : i32
    return %c0_i32, %c0_i32_0 : i32, i32
  }
  func.func @transform_3(%arg0: i32, %arg1: i32) -> (i32, i32) {
    %c0_i32 = arith.constant 0 : i32
    %c0_i32_0 = arith.constant 0 : i32
    %c0_i32_1 = arith.constant 0 : i32
    return %c0_i32, %c0_i32_0 : i32, i32
  }
  func.func @transform_4(%arg0: i32, %arg1: i32) -> (i32, i32) {
    %c0_i32 = arith.constant 0 : i32
    %c0_i32_0 = arith.constant 0 : i32
    %c0_i32_1 = arith.constant 0 : i32
    return %c0_i32, %c0_i32_0 : i32, i32
  }
  func.func @transform_5(%arg0: i32, %arg1: i32) -> (i32, i32) {
    %c0_i32 = arith.constant 0 : i32
    %c0_i32_0 = arith.constant 0 : i32
    %c0_i32_1 = arith.constant 0 : i32
    return %c0_i32, %c0_i32_0 : i32, i32
  }
  func.func @transform_6(%arg0: i32, %arg1: i32) -> (i32, i32) {
    %c0_i32 = arith.constant 0 : i32
    %c0_i32_0 = arith.constant 0 : i32
    %c0_i32_1 = arith.constant 0 : i32
    return %c0_i32, %c0_i32_0 : i32, i32
  }
  func.func @transform_7(%arg0: i32, %arg1: i32) -> (i32, i32) {
    %c0_i32 = arith.constant 0 : i32
    %c0_i32_0 = arith.constant 0 : i32
    %c0_i32_1 = arith.constant 0 : i32
    return %c0_i32, %c0_i32_0 : i32, i32
  }
  func.func @transform_8(%arg0: i32, %arg1: i32) -> (i32, i32) {
    %c0_i32 = arith.constant 0 : i32
    %c0_i32_0 = arith.constant 0 : i32
    %c0_i32_1 = arith.constant 0 : i32
    return %c0_i32, %c0_i32_0 : i32, i32
  }
  func.func @transform_9(%arg0: i32, %arg1: i32) -> (i32, i32) {
    %c0_i32 = arith.constant 0 : i32
    %c0_i32_0 = arith.constant 0 : i32
    %c0_i32_1 = arith.constant 0 : i32
    return %c0_i32, %c0_i32_0 : i32, i32
  }
  func.func @transform_10(%arg0: i32, %arg1: i32) -> (i32, i32) {
    %c0_i32 = arith.constant 0 : i32
    %c0_i32_0 = arith.constant 0 : i32
    %c0_i32_1 = arith.constant 0 : i32
    return %c0_i32, %c0_i32_0 : i32, i32
  }
  func.func @transform_11(%arg0: i32, %arg1: i32) -> (i32, i32) {
    %c0_i32 = arith.constant 0 : i32
    %c0_i32_0 = arith.constant 0 : i32
    %c0_i32_1 = arith.constant 0 : i32
    return %c0_i32, %c0_i32_0 : i32, i32
  }
  func.func @transform_12(%arg0: i32, %arg1: i32) -> (i32, i32, i32) {
    %c0_i32 = arith.constant 0 : i32
    %c0_i32_0 = arith.constant 0 : i32
    return %arg0, %arg1, %c0_i32 : i32, i32, i32
  }
}

</mosaic_0001>

<bundles_post_ra>
// kernel: tpu_custom_call.1
= control target key start
LH: loop header
LB: loop body
LE: loop exit
PB: predicated region body
PF: predicated region fallthrough
CT: control target
= control target key end

     0   :  { %s3260_s0 = inlined_call_operand.hbm [shape: f32[2,8,32], index: 0, kind: input, shape index: {}]   ;;  %s3261_s1 = inlined_call_operand.hbm [shape: bf16[2,8,8], index: 1, kind: input, shape index: {}]   ;;  %s3262_s2 = inlined_call_operand.vmem [shape: f32[1,32], index: 2, kind: input, shape index: {}]   ;;  %s3263_s3 = inlined_call_operand.vmem [shape: f32[1,32], index: 3, kind: input, shape index: {}]   ;;  %s3264_s4 = inlined_call_operand.hbm [shape: bf16[32,32], index: 4, kind: input, shape index: {}]   ;;  %s3265_s5 = inlined_call_operand.hbm [shape: f32[1,32], index: 5, kind: input, shape index: {}]   ;;  %s3266_s6 = inlined_call_operand.vmem [shape: bf16[32,32], index: 6, kind: input, shape index: {}]   ;;  %s3267_s7 = inlined_call_operand.hbm [shape: f32[1,32], index: 7, kind: input, shape index: {}]   ;;  %s3268_s8 = inlined_call_operand.hbm [shape: bf16[32,32], index: 8, kind: input, shape index: {}]   ;;  %s3269_s9 = inlined_call_operand.hbm [shape: f32[1,32], index: 9, kind: input, shape index: {}]   ;;  %s3270_s10 = inlined_call_operand.vmem [shape: bf16[32,32], index: 10, kind: input, shape index: {}]   ;;  %s3271_s11 = inlined_call_operand.vmem [shape: f32[1,32], index: 11, kind: input, shape index: {}]   ;;  %s3272_s12 = inlined_call_operand.hbm [shape: f32[2,8,32], index: 12, kind: output, shape index: {}]  }
   0x1   :  { %3279 = sst [smem:[#allocation25_spill]] %s3260_s0 }
   0x2   :  { %3280 = sst [smem:[#allocation26_spill]] %s3262_s2 }
   0x3   :  { %3281 = sst [smem:[#allocation27_spill]] %s3263_s3 }
   0x4   :  { %3282 = sst [smem:[#allocation28_spill]] %s3264_s4 }
   0x5   :  { %3283 = sst [smem:[#allocation29_spill]] %s3265_s5 }
   0x6   :  { %3284 = sst [smem:[#allocation30_spill]] %s3267_s7 }
   0x7   :  { %3285 = sst [smem:[#allocation31_spill]] %s3270_s10 }
   0x8   :  { %3286 = sst [smem:[#allocation32_spill]] %s3271_s11 }
   0x9   :  { %3287 = sst [smem:[#allocation33_spill]] %s3272_s12 }
   0xa   :  { %17 = vsyncpa [#allocation6], 0 }
   0xb   :  { %19 = vsyncpa [#allocation6 + $0x1], 0 }
   0xc   :  { %20 = vsyncpa [#allocation9], 0 }
   0xd   :  { %22 = vsyncpa [#allocation9 + $0x1], 0 }
   0xe   :  { %23 = vsyncpa [#allocation12], 0 }
   0xf   :  { %24 = vsyncpa [#allocation15], 0 }
  0x10   :  { %25 = vsyncpa [#allocation7], 0 }
  0x11   :  { %27 = vsyncpa [#allocation7 + $0x1], 0  ;;  %s2744_s21 = smov 0   ;;  %s2746_s22 = smov 0  }
  0x12   :  { %s2748_s23 = smov 0   ;;  %s2750_s24 = smov 0  }
  0x13   :  { %s2752_s25 = smov 0   ;;  %s2754_s26 = smov 0  }
  0x14 LB: > { %3288 = sst [smem:[#allocation24_spill]] %s2648_s24  ;;  %s2775_s27 = sadd.s32 4294967295, %s2656_s26   ;;  %s2656_s26 = sphi %s2754_s26, %s33_s26   ;;  %s2652_s25 = sphi %s2752_s25, %s3324_s25   ;;  %s2648_s24 = sphi %s2750_s24, %s3323_s24   ;;  %s2644_s23 = sphi %s2748_s23, %s3322_s23   ;;  %s2640_s22 = sphi %s2746_s22, %s3321_s22   ;;  %s2636_s21 = sphi %s2744_s21, %s3320_s21  }
  0x15   : > { %p2037_p0 = scmp.ge.s32.totalorder %s2656_s26, 1  ;;  %p3275_p1 = scmp.eq.s32.totalorder %s2775_s27, 0 }
  0x16   : > { %p342_p2 = scmp.lt.s32.totalorder %s2656_s26, 3  ;;  %s2658_s29 = smov [#allocation10]  }
  0x17   : > { %s360_s30 = sshll.u32 %s2658_s29, 4  ;;  %s2659_s14 = smov [#allocation11]   ;;  %s2784_s30 = int_to_ptr.vmem [resolvable:$true] %s360_s30 }
  0x18   : > { %p2780_p3 = pnand %p2037_p0, %p342_p2  ;;  %s374_s15 = sshll.u32 %s2659_s14, 4  ;;  %s2795_s15 = int_to_ptr.vmem [resolvable:$true] %s374_s15 }
  0x19   : > { %s2660_s16 = smov [#allocation14]   ;;  %s3291_s4 = sld [smem:[#allocation28_spill]] }
  0x1a   : > { %s3289_s28 = scalar_select %p2780_p3, 1, 0 }
  0x1b   : > { %p2227_p4 = pneg %p2780_p3  ;;  %s2797_s17 = sshll.u32 %s2660_s16, 4  ;;  %s399_s17 = int_to_ptr.vmem [resolvable:$true] %s2797_s17 }
  0x1d   : > { %p2791_p6 = pnand %p2227_p4, %p3275_p1 }
  0x1f   : > { %s2358_s20 = scalar_lea.hbm %s3291_s4, 256  ;;  %p2807_p8 = pneg %p2791_p6 }
  0x20   : > { %p2359_p7 = scmp.ne.s32.totalorder %s3291_s4, %s2358_s20  ;;  %p2365_p11 = scmp.lt.u32.totalorder %s2358_s20, %s3291_s4 }
  0x22   : > { %p2361_p9 = pnand %p2807_p8, %p2359_p7 }
  0x24   : > { %p2362_p10 = pneg %p2361_p9 }
  0x26   : > { %p2367_p12 = pnand %p2365_p11, %p2362_p10 }
  0x28   : > { %2370 = shalt.err (!%p2367_p12)
}
  0x29   : > { %s2371_s12 = scalar_lea.vmem %s2784_s30, 256  ;;  %p2379_p4 = scmp.lt.s32.totalorder %s2784_s30, %s2784_s30 }
  0x2a   : > { %p2372_p13 = scmp.ne.s32.totalorder %s2784_s30, %s2371_s12  ;;  %p2380_p5 = scmp.lt.s32.totalorder %s2371_s12, %s2371_s12 }
  0x2c   : > { %p2374_p0 = pnand %p2372_p13, %p2807_p8  ;;  %p2381_p7 = por %p2380_p5, %p2379_p4 }
  0x2e   : > { %p2375_p2 = pneg %p2374_p0 }
  0x30   : > { %p2382_p9 = pnand %p2381_p7, %p2375_p2 }
  0x32   : > { %2385 = shalt.err (!%p2382_p9)
}
  0x33   : > { %s2661_s18 = smov 64   ;;  %s2662_s19 = smov 4  }
  0x34   : > { %2230 = dma.hbm_to_vmem [thread:$0]  (!%p2791_p6), %s3291_s4, 256, %s2784_s30, [#allocation9], %s2661_s18, %s2661_s18, %s2662_s19  }
  0x35   : > { %s3293_s5 = sld [smem:[#allocation29_spill]] }
  0x3b   : > { %s2386_s12 = scalar_lea.hbm %s3293_s5, 16 }
  0x3c   : > { %p2387_p5 = scmp.ne.s32.totalorder %s3293_s5, %s2386_s12  ;;  %p2393_p12 = scmp.lt.u32.totalorder %s2386_s12, %s3293_s5 }
  0x3e   : > { %p2389_p10 = pnand %p2387_p5, %p2807_p8 }
  0x40   : > { %p2390_p11 = pneg %p2389_p10 }
  0x42   : > { %p2395_p13 = pnand %p2393_p12, %p2390_p11 }
  0x44   : > { %2398 = shalt.err (!%p2395_p13)
}
  0x45   : > { %s2399_s30 = scalar_lea.vmem %s2795_s15, 16  ;;  %s2406_s10 = scalar_lea.vmem %s2795_s15, 32 }
  0x46   : > { %p2400_p0 = scmp.ne.s32.totalorder %s2795_s15, %s2399_s30  ;;  %p2407_p7 = scmp.lt.s32.totalorder %s2795_s15, %s2795_s15 }
  0x47   : > { %p2408_p9 = scmp.lt.s32.totalorder %s2406_s10, %s2399_s30 }
  0x48   : > { %p2402_p2 = pnand %p2400_p0, %p2807_p8 }
  0x49   : > { %p2409_p5 = por %p2408_p9, %p2407_p7 }
  0x4a   : > { %p2403_p4 = pneg %p2402_p2 }
  0x4c   : > { %p2410_p10 = pnand %p2409_p5, %p2403_p4 }
  0x4e   : > { %2413 = shalt.err (!%p2410_p10)
}
  0x4f   : > { %2233 = dma.hbm_to_vmem [thread:$0]  (!%p2791_p6), %s3293_s5, 16, %s2795_s15, [#allocation12]  }
  0x50   : > { %s2414_s29 = scalar_lea.hbm %s3268_s8, 256 }
  0x51   : > { %p2415_p11 = scmp.ne.s32.totalorder %s3268_s8, %s2414_s29  ;;  %p2421_p0 = scmp.lt.u32.totalorder %s2414_s29, %s3268_s8 }
  0x53   : > { %p2417_p12 = pnand %p2415_p11, %p2807_p8 }
  0x55   : > { %p2418_p13 = pneg %p2417_p12 }
  0x57   : > { %p2423_p2 = pnand %p2421_p0, %p2418_p13 }
  0x59   : > { %2426 = shalt.err (!%p2423_p2)
}
  0x5a   : > { %s2427_s10 = scalar_lea.vmem %s399_s17, 256  ;;  %p2435_p5 = scmp.lt.s32.totalorder %s399_s17, %s399_s17 }
  0x5b   : > { %p2428_p4 = scmp.ne.s32.totalorder %s399_s17, %s2427_s10  ;;  %p2436_p10 = scmp.lt.s32.totalorder %s2427_s10, %s2427_s10 }
  0x5d   : > { %p2430_p7 = pnand %p2428_p4, %p2807_p8  ;;  %p2437_p1 = por %p2436_p10, %p2435_p5 }
  0x5f   : > { %p2431_p9 = pneg %p2430_p7 }
  0x61   : > { %p2438_p3 = pnand %p2437_p1, %p2431_p9 }
  0x63   : > { %2441 = shalt.err (!%p2438_p3)
}
  0x64   : > { %2239 = dma.hbm_to_vmem [thread:$0]  (!%p2791_p6), %s3268_s8, 256, %s399_s17, [#allocation15], %s2661_s18, %s2661_s18, %s2662_s19  }
  0x65   : > { %s2663_s3 = smov [#allocation13]   ;;  %s2664_s20 = smov [#allocation16]  }
  0x66   : > { %s388_s24 = sshll.u32 %s2663_s3, 4  ;;  %s412_s29 = sshll.u32 %s2664_s20, 4  ;;  %s389_s24 = int_to_ptr.vmem [resolvable:$true] %s388_s24  ;;  %s413_s29 = int_to_ptr.vmem [resolvable:$true] %s412_s29 }
  0x67   : > { %s3294_s7 = sld [smem:[#allocation30_spill]] }
  0x6d   : > { %s2442_s12 = scalar_lea.hbm %s3294_s7, 16 }
  0x6e   : > { %p2443_p1 = scmp.ne.s32.totalorder %s3294_s7, %s2442_s12  ;;  %p2449_p12 = scmp.lt.u32.totalorder %s2442_s12, %s3294_s7 }
  0x70   : > { %p2445_p3 = pnand %p2443_p1, %p2807_p8 }
  0x72   : > { %p2446_p11 = pneg %p2445_p3 }
  0x74   : > { %p2451_p13 = pnand %p2449_p12, %p2446_p11 }
  0x76   : > { %2454 = shalt.err (!%p2451_p13)
}
  0x77   : > { %s2455_s17 = scalar_lea.vmem %s389_s24, 16  ;;  %s2462_s18 = scalar_lea.vmem %s389_s24, 32 }
  0x78   : > { %p2456_p0 = scmp.ne.s32.totalorder %s389_s24, %s2455_s17  ;;  %p2463_p7 = scmp.lt.s32.totalorder %s389_s24, %s389_s24 }
  0x79   : > { %p2464_p9 = scmp.lt.s32.totalorder %s2462_s18, %s2455_s17 }
  0x7a   : > { %p2458_p2 = pnand %p2456_p0, %p2807_p8 }
  0x7b   : > { %p2465_p5 = por %p2464_p9, %p2463_p7 }
  0x7c   : > { %p2459_p4 = pneg %p2458_p2 }
  0x7e   : > { %p2466_p10 = pnand %p2465_p5, %p2459_p4 }
  0x80   : > { %2469 = shalt.err (!%p2466_p10)
}
  0x81   : > { %2236 = dma.hbm_to_vmem [thread:$0]  (!%p2791_p6), %s3294_s7, 16, %s389_s24, [#allocation12]  }
  0x82   : > { %s2470_s20 = scalar_lea.hbm %s3269_s9, 16 }
  0x83   : > { %p2471_p1 = scmp.ne.s32.totalorder %s3269_s9, %s2470_s20  ;;  %p2477_p12 = scmp.lt.u32.totalorder %s2470_s20, %s3269_s9 }
  0x85   : > { %p2473_p3 = pnand %p2471_p1, %p2807_p8 }
  0x87   : > { %p2474_p11 = pneg %p2473_p3 }
  0x89   : > { %p2479_p13 = pnand %p2477_p12, %p2474_p11 }
  0x8b   : > { %2482 = shalt.err (!%p2479_p13)
}
  0x8c   : > { %s2483_s10 = scalar_lea.vmem %s413_s29, 16  ;;  %s2490_s24 = scalar_lea.vmem %s413_s29, 32 }
  0x8d   : > { %p2484_p0 = scmp.ne.s32.totalorder %s413_s29, %s2483_s10  ;;  %p2491_p7 = scmp.lt.s32.totalorder %s413_s29, %s413_s29 }
  0x8e   : > { %p2492_p9 = scmp.lt.s32.totalorder %s2490_s24, %s2483_s10 }
  0x8f   : > { %p2486_p2 = pnand %p2484_p0, %p2807_p8 }
  0x90   : > { %p2493_p5 = por %p2492_p9, %p2491_p7 }
  0x91   : > { %p2487_p4 = pneg %p2486_p2 }
  0x93   : > { %p2494_p10 = pnand %p2493_p5, %p2487_p4 }
  0x95   : > { %2497 = shalt.err (!%p2494_p10)
}
  0x96   : > { %2242 = dma.hbm_to_vmem [thread:$0]  (!%p2791_p6), %s3269_s9, 16, %s413_s29, [#allocation15]  }
  0x97   : > { %s2036_s11 = sadd.s32 4294967294, %s2656_s26   ;;  %s45_s18 = sadd.s32 1, %s2652_s25 }
  0x98   : > { %s52_s13 = sadd.s32 1, %s2644_s23  ;;  %p47_p8 = scmp.ge.s32.totalorder %s45_s18, 2 }
  0x99   : > { %p59_p1 = scmp.ne.s32.totalorder %s2644_s23, %s2640_s22  ;;  %p60_p3 = scmp.eq.s32.totalorder %s2656_s26, 0 }
  0x9a   : > { %p65_p11 = scmp.ne.s32.totalorder %s2640_s22, %s2636_s21  ;;  %s3326_s18 = smov (%p47_p8, %s45_s18), 0 }
  0x9b   : > { %p2923_p12 = por %p60_p3, %p59_p1  ;;  %p3296_p13 = scmp.eq.s32.totalorder %s2775_s27, 0 }
  0x9c   : > { %s49_s2 = ssub.s32 %s2652_s25, %s3326_s18  ;;  %p329_p0 = scmp.eq.s32.totalorder %s2775_s27, 1 }
  0x9d   : > { %p2929_p6 = por %p3296_p13, %p65_p11  ;;  %p50_p2 = scmp.eq.s32.totalorder %s49_s2, 0 }
  0x9e   : > { %p335_p4 = scmp.eq.s32.totalorder %s2036_s11, 1  ;;  %p2936_p7 = por %p329_p0, %p59_p1 }
  0x9f   : > { %s3297_s29 = scalar_select %p2929_p6, 1, 0 }
  0xa0   : > { %s3298_s4 = scalar_select %p2936_p7, 1, 0 }
  0xa1   : > { %p2259_p9 = scmp.lt.s32.totalorder %s2656_s26, 2  ;;  %p2944_p5 = por %p335_p4, %p65_p11 }
  0xa2   : > { %s2942_s3 = scalar_select %p50_p2, %s2644_s23, %s52_s13  }
  0xa3   : > { %s3299_s20 = scalar_select %p2944_p5, 1, 0 }
  0xa4   : > { %s2949_s14 = sand.u32 1, %s2644_s23   ;;  %s2045_s12 = sshll.u32 %s2652_s25, 7 }
  0xa5   : > { %s2044_s16 = sshll.u32 %s2949_s14, 3  ;;  %s3300_s0 = sld [smem:[#allocation25_spill]] }
  0xa6   : > { %s433_s15 = scalar_lea.vmem [#allocation5], %s2044_s16  ;;  %p2962_p10 = pnand %p2259_p9, %p2923_p12 }
  0xa7   : > { %s440_s17 = sshll.u32 %s433_s15, 4  ;;  %s2046_s2 = sshll.u32 %s2949_s14, 2  ;;  %s2958_s17 = int_to_ptr.vmem [resolvable:$true] %s440_s17 }
  0xa8   : > { %s430_s30 = scalar_lea.sflag [#allocation6], %s2949_s14  ;;  %p2500_p1 = pneg %p2962_p10 }
  0xab   : > { %s2956_s24 = scalar_lea.hbm %s3300_s0, %s2045_s12  ;;  %s2503_s19 = scalar_lea.hbm %s3300_s0, 256 }
  0xac   : > { %s2498_s12 = scalar_lea.hbm %s2956_s24, 128  ;;  %p2504_p12 = scmp.lt.u32.totalorder %s2956_s24, %s3300_s0 }
  0xad   : > { %p2499_p8 = scmp.ne.s32.totalorder %s2956_s24, %s2498_s12  ;;  %p2505_p13 = scmp.lt.u32.totalorder %s2503_s19, %s2498_s12 }
  0xae   : > { %p2507_p2 = scmp.lt.u32.totalorder %s2498_s12, %s2956_s24 }
  0xaf   : > { %p2501_p3 = pnand %p2500_p1, %p2499_p8  ;;  %p2506_p0 = por %p2505_p13, %p2504_p12 }
  0xb1   : > { %p2502_p11 = pneg %p2501_p3  ;;  %p2508_p4 = por %p2507_p2, %p2506_p0 }
  0xb3   : > { %p2509_p9 = pnand %p2508_p4, %p2502_p11 }
  0xb5   : > { %2512 = shalt.err (!%p2509_p9)
}
  0xb6   : > { %s2513_s13 = scalar_lea.vmem %s2958_s17, 128  ;;  %s2665_s16 = smov [#allocation5]  }
  0xb7   : > { %p2514_p8 = scmp.ne.s32.totalorder %s2958_s17, %s2513_s13  ;;  %s2518_s10 = sshll.u32 %s2665_s16, 4  ;;  %s2519_s10 = int_to_ptr.vmem [resolvable:$false] %s2518_s10 }
  0xb8   : > { %s2520_s5 = scalar_lea.vmem %s2519_s10, 256  ;;  %p2521_p7 = scmp.lt.s32.totalorder %s2958_s17, %s2519_s10 }
  0xb9   : > { %p2516_p3 = pnand %p2514_p8, %p2500_p1  ;;  %p2522_p12 = scmp.lt.s32.totalorder %s2520_s5, %s2513_s13 }
  0xbb   : > { %p2517_p5 = pneg %p2516_p3  ;;  %p2523_p13 = por %p2522_p12, %p2521_p7 }
  0xbd   : > { %p2524_p0 = pnand %p2523_p13, %p2517_p5 }
  0xbf   : > { %2527 = shalt.err (!%p2524_p0)
}
  0xc0   : > { %2246 = dma.hbm_to_vmem [thread:$0]  (!%p2962_p10), %s2956_s24, 128, %s2958_s17, %s430_s30  }
  0xc1   : > { %s2047_s12 = sshll.u32 %s2652_s25, 6  ;;  %s451_s13 = scalar_lea.vmem [#allocation8], %s2046_s2 }
  0xc2   : > { %s2998_s16 = scalar_lea.hbm %s3261_s1, %s2047_s12  ;;  %s459_s10 = sshll.u32 %s451_s13, 4  ;;  %s460_s10 = int_to_ptr.vmem [resolvable:$true] %s459_s10 }
  0xc3   : > { %s3302_s5 = sand.u32 1, %s2656_s26   ;;  %s2528_s7 = scalar_lea.hbm %s2998_s16, 64 }
  0xc4   : > { %s448_s0 = scalar_lea.sflag [#allocation9], %s3302_s5  ;;  %p2529_p7 = scmp.ne.s32.totalorder %s2998_s16, %s2528_s7 }
  0xc5   : > { %s2533_s30 = scalar_lea.hbm %s3261_s1, 128  ;;  %p2534_p2 = scmp.lt.u32.totalorder %s2998_s16, %s3261_s1 }
  0xc6   : > { %p2531_p5 = pnand %p2529_p7, %p2500_p1  ;;  %p2535_p4 = scmp.lt.u32.totalorder %s2533_s30, %s2528_s7 }
  0xc7   : > { %p2537_p8 = scmp.lt.u32.totalorder %s2528_s7, %s2998_s16 }
  0xc8   : > { %p2532_p11 = pneg %p2531_p5  ;;  %p2536_p9 = por %p2535_p4, %p2534_p2 }
  0xca   : > { %p2538_p3 = por %p2537_p8, %p2536_p9 }
  0xcc   : > { %p2539_p12 = pnand %p2538_p3, %p2532_p11 }
  0xce   : > { %2542 = shalt.err (!%p2539_p12)
}
  0xcf   : > { %s2543_s2 = scalar_lea.vmem %s460_s10, 64  ;;  %s2666_s19 = smov [#allocation8]  }
  0xd0   : > { %p2544_p13 = scmp.ne.s32.totalorder %s460_s10, %s2543_s2  ;;  %s2548_s15 = sshll.u32 %s2666_s19, 4  ;;  %s2549_s15 = int_to_ptr.vmem [resolvable:$false] %s2548_s15 }
  0xd1   : > { %s2550_s13 = scalar_lea.vmem %s2549_s15, 128  ;;  %p2551_p5 = scmp.lt.s32.totalorder %s460_s10, %s2549_s15 }
  0xd2   : > { %p2546_p0 = pnand %p2544_p13, %p2500_p1  ;;  %p2552_p6 = scmp.lt.s32.totalorder %s2550_s13, %s2543_s2 }
  0xd4   : > { %p2547_p7 = pneg %p2546_p0  ;;  %p2553_p2 = por %p2552_p6, %p2551_p5 }
  0xd6   : > { %p2554_p4 = pnand %p2553_p2, %p2547_p7 }
  0xd8   : > { %2557 = shalt.err (!%p2554_p4)
}
  0xd9   : > { %2249 = dma.hbm_to_vmem [thread:$0]  (!%p2962_p10), %s2998_s16, 64, %s460_s10, %s448_s0  }
  0xda   : > { %p3303_p11 = scmp.ne.s32.totalorder %s3289_s28, 0 }
  0xdb   : > { %s3026_s7 = sand.u32 (!%p3303_p11), 1, %s2640_s22   ;;  %p3304_p6 = scmp.ne.s32.totalorder (!%p3303_p11), %s3297_s29, 0 }
  0xdc   : > { %468 = sbr.rel (%p3303_p11) target bundleno = 2340 (0x924), region = 68  ;;  %s2049_s5 = sshll.u32 (!%p3303_p11), %s3026_s7, 3 }
  0xdd   : > { %s471_s24 = scalar_lea.sflag (!%p3303_p11), [#allocation6], %s3026_s7  ;;  %s474_s17 = scalar_lea.vmem (!%p3303_p11), [#allocation5], %s2049_s5 }
  0xe3   : > { %2611 = dma.done.wait (%p3304_p6), %s471_s24, 128  }
  0xe4   : > { %2613 = vsyncadd (%p3304_p6), %s471_s24, 4294967168  ;;  %s479_s0 = sand.u32 1, %s2775_s27   ;;  %s2050_s28 = sshll.u32 %s3026_s7, 2 }
  0xe5   : > { %s480_s11 = scalar_lea.sflag [#allocation9], %s479_s0  ;;  %s3038_s16 = scalar_lea.vmem [#allocation8], %s2050_s28 }
  0xe6   : > { %2615 = dma.done.wait (%p3304_p6), %s480_s11, 64  }
  0xe7   : > { %2617 = vsyncadd (%p3304_p6), %s480_s11, 4294967232  ;;  %p3305_p10 = scmp.eq.s32.totalorder %s2775_s27, 0 }
  0xe9   : > { %2619 = dma.done.wait (%p3305_p10), [#allocation9], 256   ;;  %p3306_p1 = pmov %p3305_p10 }
  0xeb   : > { %2621 = vsyncadd (%p3306_p1), [#allocation9], 4294967040  ;;  %p3307_p9 = pmov %p3306_p1 }
  0xec   : > { %p3308_p8 = pmov %p3306_p1 }
  0xed   : > { %2623 = dma.done.wait (%p3307_p9), [#allocation12], 32  }
  0xee   : > { %2625 = vsyncadd (%p3308_p8), [#allocation12], 4294967264  ;;  %p3309_p3 = pmov %p3306_p1 }
  0xef   : > { %p3310_p12 = pmov %p3306_p1 }
  0xf0   : > { %2627 = dma.done.wait (%p3309_p3), [#allocation15], 272  }
  0xf1   : > { %2629 = vsyncadd (%p3310_p12), [#allocation15], 4294967024  ;;  %vm557_vm0 = vcmask 261120   ;;  %v3056_v0 = vld [vmem:[%s474_s17] sm:$0xff]  ;;  %v2332_v7 = vld [vmem:[%s3266_s6] sm:$0xff]   ;;  %v2667_v9 = vmov 0.0   ;;  %v821_v51 = vlaneseq }
  0xf2   : > { %v558_v1 = vsel %vm557_vm0, %v3056_v0, 0.0  ;;  %v2333_v8 = vld [vmem:[#allocation14] sm:$0xff]   ;;  %2121 = vmatprep.subr.bf16.mxu0 %v2667_v9  ;;  %2129 = vmatprep.subr.bf16.mxu1 %v2667_v9  ;;  %v2334_v10 = vld [vmem:[%s3266_s6 + $0x8] sm:$0xff]   ;;  %v2335_v11 = vld [vmem:[#allocation14 + $0x8] sm:$0xff]   ;;  %vm2668_vm1 = vmmov 0   ;;  %s3311_s2 = sld [smem:[#allocation26_spill]] }
  0xf3   : > { %559 = vadd.xlane.f32.xlu0 %v558_v1  ;;  %2122 = vmatpush3.bf16.msra.mxu0 %v2332_v7  ;;  %s3312_s13 = sld [smem:[#allocation27_spill]]  ;;  %vm587_vm2 = vcmask 257024   ;;  %v2336_v21 = vld [vmem:[#allocation10] sm:$0xff]   ;;  %v2337_v23 = vld [vmem:[#allocation10 + $0x8] sm:$0xff]   ;;  %v2059_v25 = vld [vmem:[#allocation13] ss:$0 sm:$0xff] }
  0xf4   : > { %2130 = vmatpush3.bf16.msra.mxu1 %v2333_v8  ;;  %2123 = vmatprep.subr.bf16.mxu0 %v2667_v9  ;;  %v2063_v26 = vld [vmem:[#allocation16] ss:$0 sm:$0xff]  ;;  %v2067_v43 = vld [vmem:[#allocation11] ss:$0 sm:$0xff]  ;;  %s2669_s24 = smov 104   ;;  %s2670_s17 = smov 120  }
  0xf5   : > { %2131 = vmatprep.subr.bf16.mxu1 %v2667_v9  ;;  %2125 = vmatprep.mubr.msk.bf16.mxu0 %vm2668_vm1, %v2667_v9  ;;  %s2671_s0 = smov 112   ;;  %v2672_v49 = vmov 1983009808   ;;  %v2673_v54 = vmov 1934713408   ;;  %v822_v57 = vshrl.u32 %v821_v51, 7 }
  0xf6   : > { %2133 = vmatprep.mubr.msk.bf16.mxu1 %vm2668_vm1, %v2667_v9  ;;  %v819_v50 = vunpack.c.l.s4 %v2672_v49  ;;  %v851_v55 = vunpack.c.l.s4 %v2673_v54  ;;  %vm1043_vm3 = vcmask 1043456   ;;  %vm1039_vm4 = vcmask 64512   ;;  %s2675_s27 = smov 16   ;;  %s2676_s30 = smov 8  }
  0xf7   : > { %2124 = vmatpush3.bf16.msra.mxu0 %v2334_v10  ;;  %s3314_s14 = sld [smem:[#allocation24_spill]]  ;;  %s2677_s12 = smov 24   ;;  %vm1798_vm5 = vcmask 130048   ;;  %vm1800_vm6 = vcmask 195584  }
  0xf8   : > { %2132 = vmatpush3.bf16.msra.mxu1 %v2335_v11  ;;  %2137 = vmatprep.subr.bf16.mxu0 %v2667_v9  ;;  %v2057_v16 = vld [vmem:[%s3311_s2] ss:$0 sm:$0xff]  ;;  %v820_v56 = vunpack.c.0.s8 %v819_v50  ;;  %v852_v59 = vunpack.c.0.s8 %v851_v55  ;;  %s3315_s15 = sld [smem:[#allocation32_spill]]  ;;  %s3316_s11 = sld [smem:[#allocation33_spill]] }
  0xf9   : > { %2145 = vmatprep.subr.bf16.mxu1 %v2667_v9  ;;  %v2058_v18 = vld [vmem:[%s3312_s13] ss:$0 sm:$0xff]  ;;  %p3317_p0 = scmp.ne.s32.totalorder %s3298_s4, 0 }
  0xfa   : > { %v3104_v60 = vsub.s32 %v820_v56, %v822_v57 }
  0xfd   : > { %s2090_s13 = sshll.u32 %s3314_s14, 7 }
  0xfe   : > { %s3210_s29 = scalar_lea.hbm %s3316_s11, %s2090_s13 }
 0x180   : > { %v560_v2 = vpop.xlane.xlu0 %559 }
 0x181   : > { %v562_v3 = vmul.f32 0.03125, %v560_v2 }
 0x183   : > { %v563_v4 = vsub.f32 %v3056_v0, %v562_v3  ;;  %v3106_v3 = vsub.s32 %v852_v59, %v822_v57 }
 0x185   : > { %v564_v5 = vmul.f32 %v563_v4, %v563_v4 }
 0x187   : > { %v565_v6 = vsel %vm557_vm0, %v564_v5, 0.0 }
 0x188   : > { %566 = vadd.xlane.f32.xlu0 %v565_v6 }
 0x215   : > { %v567_v12 = vpop.xlane.xlu0 %566 }
 0x216   : > { %v568_v13 = vmul.f32 0.03125, %v567_v12 }
 0x218   : > { %v569_v14 = vadd.f32 1e-05, %v568_v13 }
 0x21a   : > { %2340 = vrsqrt.f32 %v569_v14 }
 0x224   : > { %v2341_v15 = vpop.eup %2340 }
 0x225   : > { %v571_v17 = vmul.f32 %v2341_v15, %v563_v4 }
 0x227   : > { %v578_v19 = vmul.f32 %v2057_v16, %v571_v17 }
 0x229   : > { %v585_v20 = vadd.f32 %v2058_v18, %v578_v19 }
 0x22b   : > { %v586_v22 = vpack.c.bf16 %v585_v20, %v585_v20 }
 0x22d   : > { %588 = vst.msk [vmem:[#allocation2] sm:$0xf] %vm587_vm2, %v586_v22  ;;  %2126 = vmatmul.mubr.msk.bf16.vlgmr.msra.gmra.mrb[0].mxu0 %vm557_vm0, %v586_v22  ;;  %2134 = vmatmul.mubr.msk.bf16.vlgmr.msra.gmra.mrb[0].mxu1 %vm557_vm0, %v586_v22 }
 0x22e   : > { %2138 = vmatpush3.bf16.msra.mxu0 %v2336_v21  ;;  %2141 = vmatprep.mubr.msk.bf16.mxu0 %vm2668_vm1, %v2667_v9 }
 0x22f   : > { %2139 = vmatprep.subr.bf16.mxu0 %v2667_v9  ;;  %2147 = vmatprep.mubr.msk.bf16.mxu1 %vm2668_vm1, %v2667_v9 }
 0x232   : > { %2140 = vmatpush3.bf16.msra.mxu0 %v2337_v23 }
 0x233   : > { %2151 = vmatprep.subr.bf16.mxu0 %v2667_v9 }
 0x234   : > { %v729_v24 = vld [vmem:[#allocation2] sm:$0xf] }
 0x235   : > { %2142 = vmatmul.mubr.msk.bf16.vlgmr.msra.gmra.mrb[4].mxu0 %vm557_vm0, %v729_v24 }
 0x236   : > { %2153 = vmatprep.mubr.msk.bf16.mxu0 %vm2668_vm1, %v2667_v9 }
 0x300   : > { %v649_v27 = vpop.f32.mrb[0].mxu0  ;;  %v714_v28 = vpop.f32.mrb[0].mxu1 }
 0x301   : > { %v650_v29 = vadd.f32 %v2059_v25, %v649_v27  ;;  %v715_v30 = vadd.f32 %v2063_v26, %v714_v28  ;;  %v2127_v31 = vpop.f32.mrb[1].mxu0  ;;  %v2135_v32 = vpop.f32.mrb[1].mxu1 }
 0x302   : > { %v652_v33 = vpop.f32.mrb[2].mxu0  ;;  %v717_v34 = vpop.f32.mrb[2].mxu1 }
 0x303   : > { %v655_v35 = vpack.c.bf16 %v650_v29, %v650_v29  ;;  %v720_v36 = vpack.c.bf16 %v715_v30, %v715_v30  ;;  %v2128_v37 = vpop.f32.mrb[3].mxu0  ;;  %v2136_v38 = vpop.f32.mrb[3].mxu1  ;;  %v2674_v33 = vmov 0  }
 0x305   : > { %656 = vst.msk [vmem:[#allocation3] sm:$0xf] %vm587_vm2, %v655_v35  ;;  %721 = vst.msk [vmem:[#allocation4] sm:$0xf] %vm587_vm2, %v720_v36 }
 0x308   : > { %v799_v39 = vpop.f32.mrb[4].mxu0 }
 0x309   : > { %v2143_v40 = vpop.f32.mrb[5].mxu0  ;;  %v800_v45 = vadd.f32 %v2067_v43, %v799_v39 }
 0x30a   : > { %v802_v41 = vpop.f32.mrb[6].mxu0 }
 0x30b   : > { %v2144_v42 = vpop.f32.mrb[7].mxu0  ;;  %v805_v46 = vmul.f32 0.35355338, %v800_v45 }
 0x30c   : > { %v730_v44 = vld [vmem:[#allocation3] sm:$0xf] }
 0x30d   : > { %899 = vrot.lane.b32.xlu0 %v730_v44, %s2669_s24  ;;  %893 = vrot.lane.b32.xlu1 %v730_v44, %s2670_s17 }
 0x311   : > { %896 = vrot.lane.b32.xlu1 %v730_v44, %s2671_s0 }
 0x315   : > { %807 = vrot.lane.b32.xlu1 %v805_v46, %s2670_s17 }
 0x319   : > { %810 = vrot.lane.b32.xlu1 %v805_v46, %s2671_s0 }
 0x31d   : > { %813 = vrot.lane.b32.xlu1 %v805_v46, %s2669_s24 }
 0x340   : > { %975 = vxpose.xlu1.c.b16.start.end [1/1] (short) (narrow) %v730_v44, 16 }
 0x37f   : > { %v894_v47 = vpop.permute.xlu1 %893  ;;  %v900_v52 = vpop.permute.xlu0 %899 }
 0x380   : > { %991 = vxpose.xlu0.c.b16.start.end [1/1] (short) (narrow) %v894_v47, 16 }
 0x383   : > { %v897_v48 = vpop.permute.xlu1 %896 }
 0x384   : > { %1007 = vxpose.xlu1.c.b16.start.end [1/1] (short) (narrow) %v897_v48, 16 }
 0x387   : > { %v808_v53 = vpop.permute.xlu1 %807 }
 0x388   : > { %1023 = vxpose.xlu1.c.b16.start.end [1/1] (short) (narrow) %v900_v52, 16  ;;  %v732_v52 = vld [vmem:[%s3038_s16] sm:$0xf]  ;;  %s3313_s16 = sld [smem:[#allocation31_spill]] }
 0x38b   : > { %v811_v58 = vpop.permute.xlu1 %810 }
 0x38c   : > { %v816_v61 = vcombine.low %v805_v46, %v811_v58  ;;  %v817_v62 = vcombine.high %v805_v46, %v811_v58 }
 0x38e   : > { %v824_v4 = vrot.slane %v816_v61, %v3104_v60  ;;  %v831_v5 = vrot.slane %v817_v62, %v3104_v60 }
 0x38f   : > { %v814_v63 = vpop.permute.xlu1 %813 }
 0x390   : > { %v832_v1 = vcombine.low %v808_v53, %v814_v63  ;;  %v833_v2 = vcombine.high %v808_v53, %v814_v63  ;;  %v912_v53 = vunpack.c.l.bf16 %v732_v52 }
 0x392   : > { %v840_v6 = vrot.slane %v832_v1, %v3104_v60  ;;  %v847_v7 = vrot.slane %v833_v2, %v3104_v60 }
 0x394   : > { %v848_v8 = vcombine.low %v824_v4, %v840_v6  ;;  %v849_v10 = vcombine.high %v824_v4, %v840_v6  ;;  %v864_v11 = vcombine.low %v831_v5, %v847_v7  ;;  %v865_v12 = vcombine.high %v831_v5, %v847_v7 }
 0x396   : > { %v856_v13 = vrot.slane %v848_v8, %v3106_v3  ;;  %v863_v14 = vrot.slane %v849_v10, %v3106_v3  ;;  %v872_v15 = vrot.slane %v864_v11, %v3106_v3  ;;  %v879_v16 = vrot.slane %v865_v12, %v3106_v3 }
 0x398   : > { %v880_v17 = vcombine.high %v856_v13, %v2667_v9  ;;  %v881_v18 = vcombine.high %v863_v14, %v2667_v9  ;;  %v882_v19 = vcombine.high %v872_v15, %v2667_v9  ;;  %v883_v20 = vcombine.high %v879_v16, %v2667_v9 }
 0x399   : > { %v2071_v21 = vpack.c.bf16 %v872_v15, %v856_v13  ;;  %v2072_v22 = vpack.c.bf16 %v879_v16, %v863_v14 }
 0x39a   : > { %v2073_v23 = vpack.c.bf16 %v882_v19, %v880_v17  ;;  %v2074_v24 = vpack.c.bf16 %v883_v20, %v881_v18  ;;  %v731_v18 = vld [vmem:[#allocation4] sm:$0xf] }
 0x39b   : > { %v920_v25 = vrot.slane %v2071_v21, %v3104_v60  ;;  %v928_v26 = vrot.slane %v2072_v22, %v3104_v60 }
 0x39c   : > { %v945_v27 = vrot.slane %v2073_v23, %v3104_v60  ;;  %v953_v28 = vrot.slane %v2074_v24, %v3104_v60 }
 0x39d   : > { %v929_v29 = vcombine.low %v920_v25, %v928_v26 }
 0x39e   : > { %v954_v30 = vcombine.low %v945_v27, %v953_v28 }
 0x39f   : > { %v936_v31 = vrot.slane %v929_v29, %v3106_v3 }
 0x3a0   : > { %v961_v32 = vrot.slane %v954_v30, %v3106_v3 }
 0x3a1   : > { %v937_v34 = vcombine.high %v936_v31, %v2674_v33  ;;  %v966_v46 = vshrl.u32 %v936_v31, 16 }
 0x3a2   : > { %v962_v35 = vcombine.high %v961_v32, %v2674_v33  ;;  %v965_v42 = vpack.i.b16 %v961_v32, %v936_v31  ;;  %v967_v43 = vshrl.u32 %v961_v32, 16 }
 0x3a3   : > { %v972_v37 = vshrl.u32 %v937_v34, 16 }
 0x3a4   : > { %v971_v36 = vpack.i.b16 %v962_v35, %v937_v34  ;;  %v973_v38 = vshrl.u32 %v962_v35, 16  ;;  %v968_v47 = vpack.i.b16 %v967_v43, %v966_v46 }
 0x3a6   : > { %v983_v39 = vpop.trf.xlu1  ;;  %v974_v40 = vpack.i.b16 %v973_v38, %v972_v37 }
 0x3a7   : > { %v1045_v41 = vsel %vm1043_vm3, %v983_v39, 0 }
 0x3a8   : > { %2146 = vmatpush3.bf16.msra.mxu1 %v1045_v41 }
 0x3a9   : > { %2157 = vmatprep.subr.bf16.mxu1 %v2667_v9 }
 0x3ab   : > { %2148 = vmatmul.mubr.msk.bf16.vlgmr.msra.gmra.mrb[4].mxu1 %vm1039_vm4, %v965_v42 }
 0x3ac   : > { %2159 = vmatprep.mubr.msk.bf16.mxu1 %vm2668_vm1, %v2667_v9 }
 0x3e6   : > { %v999_v44 = vpop.trf.xlu0 }
 0x3e7   : > { %v1091_v45 = vsel %vm1043_vm3, %v999_v44, 0 }
 0x3e8   : > { %2152 = vmatpush3.bf16.msra.mxu0 %v1091_v45 }
 0x3e9   : > { %2163 = vmatprep.subr.bf16.mxu0 %v2667_v9 }
 0x3ea   : > { %v1015_v48 = vpop.trf.xlu1 }
 0x3eb   : > { %v1137_v49 = vsel %vm1043_vm3, %v1015_v48, 0  ;;  %2154 = vmatmul.mubr.msk.bf16.vlgmr.msra.gmra.mrb[8].mxu0 %vm1039_vm4, %v968_v47 }
 0x3ec   : > { %2158 = vmatpush3.bf16.msra.mxu1 %v1137_v49  ;;  %2165 = vmatprep.mubr.msk.bf16.mxu0 %vm2668_vm1, %v2667_v9 }
 0x3ed   : > { %2169 = vmatprep.subr.bf16.mxu1 %v2667_v9 }
 0x3ee   : > { %v1031_v50 = vpop.trf.xlu1 }
 0x3ef   : > { %v1183_v51 = vsel %vm1043_vm3, %v1031_v50, 0  ;;  %2160 = vmatmul.mubr.msk.bf16.vlgmr.msra.gmra.mrb[8].mxu1 %vm1039_vm4, %v971_v36 }
 0x3f0   : > { %2164 = vmatpush3.bf16.msra.mxu0 %v1183_v51  ;;  %2171 = vmatprep.mubr.msk.bf16.mxu1 %vm2668_vm1, %v2667_v9 }
 0x3f1   : > { %2175 = vmatprep.subr.bf16.mxu0 %v2667_v9 }
 0x3f3   : > { %2166 = vmatmul.mubr.msk.bf16.vlgmr.msra.gmra.mrb[12].mxu0 %vm1039_vm4, %v974_v40 }
 0x3f4   : > { %2177 = vmatprep.mubr.msk.bf16.mxu0 %vm2668_vm1, %v2667_v9 }
 0x47e   : > { %v1081_v54 = vpop.f32.mrb[4].mxu1 }
 0x47f   : > { %v1082_v55 = vadd.f32 %v1081_v54, %v912_v53  ;;  %v2149_v56 = vpop.f32.mrb[5].mxu1 }
 0x480   : > { %v1084_v57 = vpop.f32.mrb[6].mxu1 }
 0x481   : > { %v2150_v58 = vpop.f32.mrb[7].mxu1  ;;  %v1225_v59 = vsel %vm1039_vm4, %v1082_v55, -inf }
 0x482   : > { %1226 = vmax.xlane.f32.xlu0 %v1225_v59 }
 0x4be   : > { %v1127_v61 = vpop.f32.mrb[8].mxu0 }
 0x4bf   : > { %v1128_v62 = vadd.f32 %v1127_v61, %v912_v53  ;;  %v2155_v63 = vpop.f32.mrb[9].mxu0 }
 0x4c0   : > { %v1130_v1 = vpop.f32.mrb[10].mxu0 }
 0x4c1   : > { %v2156_v2 = vpop.f32.mrb[11].mxu0  ;;  %v1228_v4 = vsel %vm1039_vm4, %v1128_v62, -inf }
 0x4c2   : > { %v1173_v5 = vpop.f32.mrb[8].mxu1  ;;  %1229 = vmax.xlane.f32.xlu1 %v1228_v4 }
 0x4c3   : > { %v1174_v6 = vadd.f32 %v1173_v5, %v912_v53  ;;  %v2161_v7 = vpop.f32.mrb[9].mxu1 }
 0x4c4   : > { %v1176_v8 = vpop.f32.mrb[10].mxu1 }
 0x4c5   : > { %v2162_v10 = vpop.f32.mrb[11].mxu1  ;;  %v1231_v11 = vsel %vm1039_vm4, %v1174_v6, -inf }
 0x4c6   : > { %1232 = vmax.xlane.f32.xlu0 %v1231_v11  ;;  %v1219_v12 = vpop.f32.mrb[12].mxu0 }
 0x4c7   : > { %v1220_v13 = vadd.f32 %v1219_v12, %v912_v53  ;;  %v2167_v14 = vpop.f32.mrb[13].mxu0 }
 0x4c8   : > { %v1222_v15 = vpop.f32.mrb[14].mxu0 }
 0x4c9   : > { %v2168_v16 = vpop.f32.mrb[15].mxu0  ;;  %v1234_v17 = vsel %vm1039_vm4, %v1220_v13, -inf }
 0x4ca   : > { %1235 = vmax.xlane.f32.xlu1 %v1234_v17 }
 0x4dc   : > { %903 = vrot.lane.b32.xlu0 %v731_v18, %s2670_s17 }
 0x4e0   : > { %909 = vrot.lane.b32.xlu0 %v731_v18, %s2669_s24  ;;  %s548_s24 = scalar_lea.vmem [#allocation17], %s2049_s5  ;;  %s1867_s5 = scalar_lea.sflag [#allocation7], %s3026_s7 }
 0x4e1   : > { %s1881_s17 = sshll.u32 %s548_s24, 4  ;;  %s3212_s17 = int_to_ptr.vmem [resolvable:$true] %s1881_s17 }
 0x4e2   : > { %s2558_s10 = scalar_lea.vmem %s3212_s17, 128 }
 0x4e3   : > { %p2559_p13 = scmp.ne.s32.totalorder %s3212_s17, %s2558_s10 }
 0x4e5   : > { %p2560_p7 = pnand %p2559_p13, %p3317_p0 }
 0x4e7   : > { %p2561_p5 = pneg %p2560_p7 }
 0x50f   : > { %v1227_v19 = vpop.xlane.xlu0 %1226 }
 0x510   : > { %v1237_v20 = vsub.f32 %v1082_v55, %v1227_v19 }
 0x512   : > { %v1241_v21 = vmul.f32 1.442695, %v1237_v20 }
 0x514   : > { %2342 = vpow2.f32 %v1241_v21 }
 0x51e   : > { %v2343_v22 = vpop.eup %2342 }
 0x51f   : > { %v1249_v23 = vsel %vm1039_vm4, %v2343_v22, 0.0 }
 0x520   : > { %1250 = vadd.xlane.f32.xlu1 %v1249_v23 }
 0x54f   : > { %v1230_v24 = vpop.xlane.xlu1 %1229 }
 0x550   : > { %v1238_v25 = vsub.f32 %v1128_v62, %v1230_v24 }
 0x552   : > { %v1243_v26 = vmul.f32 1.442695, %v1238_v25 }
 0x553   : > { %v1233_v27 = vpop.xlane.xlu0 %1232 }
 0x554   : > { %2344 = vpow2.f32 %v1243_v26  ;;  %v1239_v28 = vsub.f32 %v1174_v6, %v1233_v27 }
 0x556   : > { %v1245_v29 = vmul.f32 1.442695, %v1239_v28 }
 0x557   : > { %v1236_v34 = vpop.xlane.xlu1 %1235  ;;  %v904_v44 = vpop.permute.xlu0 %903 }
 0x558   : > { %2346 = vpow2.f32 %v1245_v29  ;;  %v1240_v35 = vsub.f32 %v1220_v13, %v1236_v34 }
 0x55a   : > { %v1247_v36 = vmul.f32 1.442695, %v1240_v35 }
 0x55b   : > { %v910_v45 = vpop.permute.xlu0 %909 }
 0x55c   : > { %2348 = vpow2.f32 %v1247_v36 }
 0x55e   : > { %v2345_v30 = vpop.eup %2344 }
 0x55f   : > { %v1252_v31 = vsel %vm1039_vm4, %v2345_v30, 0.0 }
 0x560   : > { %1253 = vadd.xlane.f32.xlu1 %v1252_v31 }
 0x562   : > { %v2347_v32 = vpop.eup %2346 }
 0x563   : > { %v1255_v33 = vsel %vm1039_vm4, %v2347_v32, 0.0 }
 0x564   : > { %1256 = vadd.xlane.f32.xlu0 %v1255_v33 }
 0x566   : > { %v2349_v37 = vpop.eup %2348 }
 0x567   : > { %v1258_v38 = vsel %vm1039_vm4, %v2349_v37, 0.0 }
 0x571   : > { %906 = vrot.lane.b32.xlu1 %v731_v18, %s2671_s0 }
 0x591   : > { %1273 = vxpose.xlu0.c.b16.start.end [1/1] (short) (narrow) %v731_v18, 16 }
 0x595   : > { %1259 = vadd.xlane.f32.xlu1 %v1258_v38  ;;  %v2338_v38 = vld [vmem:[%s3313_s16] sm:$0xff]  }
 0x5ad   : > { %v1251_v39 = vpop.xlane.xlu1 %1250 }
 0x5ae   : > { %2350 = vrcp.f32 %v1251_v39 }
 0x5b8   : > { %v2351_v40 = vpop.eup %2350 }
 0x5b9   : > { %v1262_v41 = vmul.f32 %v2351_v40, %v2343_v22 }
 0x5bb   : > { %v1269_v42 = vpack.c.bf16 %v1262_v41, %v1262_v41 }
 0x5bd   : > { %v1341_v43 = vsel %vm1039_vm4, %v1269_v42, 0 }
 0x5be   : > { %2170 = vmatpush3.bf16.xpose.msra.mxu1 %v1341_v43 }
 0x5bf   : > { %2181 = vmatprep.subr.bf16.mxu1 %v2667_v9 }
 0x5c2   : > { %1289 = vxpose.xlu1.c.b16.start.end [1/1] (short) (narrow) %v904_v44, 16 }
 0x5ed   : > { %v1254_v46 = vpop.xlane.xlu1 %1253 }
 0x5ee   : > { %2352 = vrcp.f32 %v1254_v46 }
 0x5f1   : > { %v1257_v47 = vpop.xlane.xlu0 %1256  ;;  %v907_v48 = vpop.permute.xlu1 %906 }
 0x5f2   : > { %2354 = vrcp.f32 %v1257_v47  ;;  %1305 = vxpose.xlu0.c.b16.start.end [1/1] (short) (narrow) %v907_v48, 16  ;;  %v2339_v47 = vld [vmem:[%s3313_s16 + $0x8] sm:$0xff]  }
 0x5f6   : > { %1321 = vxpose.xlu0.c.b16.start.end [1/1] (short) (narrow) %v910_v45, 16 }
 0x5f7   : > { %v1281_v49 = vpop.trf.xlu0 }
 0x5f8   : > { %v2353_v50 = vpop.eup %2352  ;;  %2172 = vmatmul.mubr.msk.bf16.vlgmr.msra.gmra.mrb[12].mxu1 %vm1039_vm4, %v1281_v49 }
 0x5f9   : > { %v1264_v51 = vmul.f32 %v2353_v50, %v2345_v30  ;;  %2183 = vmatprep.mubr.msk.bf16.mxu1 %vm2668_vm1, %v2667_v9 }
 0x5fb   : > { %v1270_v52 = vpack.c.bf16 %v1264_v51, %v1264_v51 }
 0x5fc   : > { %v2355_v53 = vpop.eup %2354 }
 0x5fd   : > { %v1387_v54 = vsel %vm1039_vm4, %v1270_v52, 0  ;;  %v1266_v55 = vmul.f32 %v2355_v53, %v2347_v32 }
 0x5fe   : > { %2176 = vmatpush3.bf16.xpose.msra.mxu0 %v1387_v54 }
 0x5ff   : > { %v1271_v56 = vpack.c.bf16 %v1266_v55, %v1266_v55  ;;  %2187 = vmatprep.subr.bf16.mxu0 %v2667_v9 }
 0x601   : > { %v1433_v57 = vsel %vm1039_vm4, %v1271_v56, 0 }
 0x602   : > { %2182 = vmatpush3.bf16.xpose.msra.mxu1 %v1433_v57 }
 0x603   : > { %2193 = vmatprep.subr.bf16.mxu1 %v2667_v9 }
 0x622   : > { %v1260_v58 = vpop.xlane.xlu1 %1259 }
 0x623   : > { %2356 = vrcp.f32 %v1260_v58 }
 0x628   : > { %v1297_v59 = vpop.trf.xlu1 }
 0x629   : > { %2178 = vmatmul.mubr.msk.bf16.vlgmr.msra.gmra.mrb[16].mxu0 %vm1039_vm4, %v1297_v59 }
 0x62a   : > { %2189 = vmatprep.mubr.msk.bf16.mxu0 %vm2668_vm1, %v2667_v9 }
 0x62d   : > { %v2357_v61 = vpop.eup %2356 }
 0x62e   : > { %v1268_v62 = vmul.f32 %v2357_v61, %v2349_v37 }
 0x630   : > { %v1272_v63 = vpack.c.bf16 %v1268_v62, %v1268_v62 }
 0x632   : > { %v1479_v1 = vsel %vm1039_vm4, %v1272_v63, 0 }
 0x633   : > { %2188 = vmatpush3.bf16.xpose.msra.mxu0 %v1479_v1 }
 0x658   : > { %v1313_v2 = vpop.trf.xlu0 }
 0x659   : > { %2184 = vmatmul.mubr.msk.bf16.vlgmr.msra.gmra.mrb[16].mxu1 %vm1039_vm4, %v1313_v2 }
 0x65a   : > { %2197 = vmatprep.mubr.msk.bf16.mxu1 %vm2668_vm1, %v2667_v9  ;;  %2194 = vmatpush3.bf16.msra.mxu1 %v2338_v38 }
 0x65b   : > { %2195 = vmatprep.subr.bf16.mxu1 %v2667_v9 }
 0x65c   : > { %v1329_v4 = vpop.trf.xlu0 }
 0x65d   : > { %2190 = vmatmul.mubr.msk.bf16.vlgmr.msra.gmra.mrb[20].mxu0 %vm1039_vm4, %v1329_v4 }
 0x65e   : > { %2196 = vmatpush3.bf16.msra.mxu1 %v2339_v47 }
 0x6cb   : > { %v1377_v5 = vpop.f32.mrb[12].mxu1 }
 0x6cc   : > { %v2173_v6 = vpop.f32.mrb[13].mxu1  ;;  %1521 = vxpose.xlu1.b32.start.end [1/1] (short) (narrow) %v1377_v5, 8 }
 0x6cd   : > { %v1380_v7 = vpop.f32.mrb[14].mxu1 }
 0x6ce   : > { %v2174_v8 = vpop.f32.mrb[15].mxu1  ;;  %v2085_v7 = vld [vmem:[%s3315_s15] ss:$0 sm:$0xff] }
 0x6fc   : > { %v1423_v10 = vpop.f32.mrb[16].mxu0 }
 0x6fd   : > { %1553 = vxpose.xlu0.b32.start.end [1/1] (short) (narrow) %v1423_v10, 8  ;;  %v2179_v11 = vpop.f32.mrb[17].mxu0 }
 0x6fe   : > { %v1426_v12 = vpop.f32.mrb[18].mxu0 }
 0x6ff   : > { %v2180_v13 = vpop.f32.mrb[19].mxu0 }
 0x72c   : > { %v1469_v14 = vpop.f32.mrb[16].mxu1 }
 0x72d   : > { %1585 = vxpose.xlu0.b32.start.end [1/1] (short) (narrow) %v1469_v14, 8  ;;  %v2185_v15 = vpop.f32.mrb[17].mxu1 }
 0x72e   : > { %v1472_v16 = vpop.f32.mrb[18].mxu1 }
 0x72f   : > { %v2186_v17 = vpop.f32.mrb[19].mxu1 }
 0x730   : > { %v1515_v18 = vpop.f32.mrb[20].mxu0 }
 0x731   : > { %1617 = vxpose.xlu0.b32.start.end [1/1] (short) (narrow) %v1515_v18, 8  ;;  %v2191_v19 = vpop.f32.mrb[21].mxu0 }
 0x732   : > { %v1518_v20 = vpop.f32.mrb[22].mxu0 }
 0x733   : > { %v2192_v21 = vpop.f32.mrb[23].mxu0 }
 0x74c   : > { %v1537_v24 = vpop.trf.xlu1 }
 0x77d   : > { %v1569_v22 = vpop.trf.xlu0 }
 0x7ad   : > { %v1601_v23 = vpop.trf.xlu0 }
 0x7ae   : > { %v1649_v25 = vcombine.low %v1537_v24, %v1601_v23  ;;  %v1650_v26 = vcombine.high %v1537_v24, %v1601_v23 }
 0x7b0   : > { %v1657_v30 = vrot.slane %v1649_v25, %v3104_v60  ;;  %v1664_v31 = vrot.slane %v1650_v26, %v3104_v60 }
 0x7b1   : > { %v1633_v27 = vpop.trf.xlu0 }
 0x7b2   : > { %v1665_v28 = vcombine.low %v1569_v22, %v1633_v27  ;;  %v1666_v29 = vcombine.high %v1569_v22, %v1633_v27 }
 0x7b4   : > { %v1673_v32 = vrot.slane %v1665_v28, %v3104_v60  ;;  %v1680_v33 = vrot.slane %v1666_v29, %v3104_v60 }
 0x7b6   : > { %v1681_v34 = vcombine.low %v1657_v30, %v1673_v32  ;;  %v1682_v35 = vcombine.high %v1657_v30, %v1673_v32  ;;  %v1697_v36 = vcombine.low %v1664_v31, %v1680_v33  ;;  %v1698_v37 = vcombine.high %v1664_v31, %v1680_v33 }
 0x7b8   : > { %v1689_v39 = vrot.slane %v1681_v34, %v3106_v3  ;;  %v1696_v40 = vrot.slane %v1682_v35, %v3106_v3  ;;  %v1705_v41 = vrot.slane %v1697_v36, %v3106_v3  ;;  %v1712_v42 = vrot.slane %v1698_v37, %v3106_v3 }
 0x7ba   : > { %v1717_v43 = vcombine.low %v1689_v39, %v1696_v40  ;;  %v2083_v44 = vcombine.high %v1689_v39, %v1696_v40  ;;  %v1733_v45 = vcombine.low %v1705_v41, %v1712_v42  ;;  %v2084_v46 = vcombine.high %v1705_v41, %v1712_v42 }
 0x7bc   : > { %v1724_v48 = vrot.slane %v1717_v43, %v3104_v60  ;;  %v1732_v49 = vrot.slane %v2083_v44, %v3104_v60  ;;  %v1740_v50 = vrot.slane %v1733_v45, %v3104_v60  ;;  %v1748_v51 = vrot.slane %v2084_v46, %v3104_v60 }
 0x7be   : > { %v1750_v52 = vcombine.high %v1724_v48, %v1732_v49  ;;  %v1766_v53 = vcombine.high %v1740_v50, %v1748_v51  ;;  %v1749_v9 = vcombine.low %v1724_v48, %v1732_v49  ;;  %v1765_v54 = vcombine.low %v1740_v50, %v1748_v51 }
 0x7c0   : > { %v1764_v55 = vrot.slane %v1750_v52, %v3106_v3  ;;  %v1780_v56 = vrot.slane %v1766_v53, %v3106_v3  ;;  %v1757_v57 = vrot.slane %v1749_v9, %v3106_v3  ;;  %v1773_v58 = vrot.slane %v1765_v54, %v3106_v3 }
 0x7c2   : > { %v1783_v59 = vcombine.low %v1764_v55, %v1780_v56  ;;  %v1782_v61 = vcombine.high %v1757_v57, %v1773_v58  ;;  %v1781_v62 = vcombine.low %v1757_v57, %v1773_v58  ;;  %v1784_v60 = vcombine.high %v1764_v55, %v1780_v56 }
 0x7c4   : > { %1790 = vrot.lane.b32.xlu0 %v1783_v59, %s2675_s27  ;;  %1786 = vrot.lane.b32.xlu1 %v1782_v61, %s2676_s30  ;;  %s2678_s27 = smov [#allocation17]  }
 0x7c5   : > { %s2562_s30 = sshll.u32 %s2678_s27, 4  ;;  %s2563_s30 = int_to_ptr.vmem [resolvable:$false] %s2562_s30 }
 0x7c6   : > { %s2564_s14 = scalar_lea.vmem %s2563_s30, 256  ;;  %p2565_p2 = scmp.lt.s32.totalorder %s3212_s17, %s2563_s30 }
 0x7c7   : > { %p2566_p4 = scmp.lt.s32.totalorder %s2564_s14, %s2558_s10 }
 0x7c8   : > { %1794 = vrot.lane.b32.xlu1 %v1784_v60, %s2677_s12 }
 0x7c9   : > { %p2567_p11 = por %p2566_p4, %p2565_p2 }
 0x7cb   : > { %p2568_p6 = pnand %p2567_p11, %p2561_p5 }
 0x836   : > { %v1787_v63 = vpop.permute.xlu1 %1786  ;;  %v1791_v1 = vpop.permute.xlu0 %1790 }
 0x837   : > { %v1797_v2 = vsel %vm1039_vm4, %v1781_v62, %v1787_v63 }
 0x838   : > { %v1799_v3 = vsel %vm1798_vm5, %v1797_v2, %v1791_v1 }
 0x83a   : > { %v1795_v4 = vpop.permute.xlu1 %1794 }
 0x83b   : > { %v1801_v5 = vsel %vm1800_vm6, %v1799_v3, %v1795_v4 }
 0x83c   : > { %v1802_v6 = vpack.c.bf16 %v1801_v5, %v1801_v5 }
 0x83e   : > { %2198 = vmatmul.mubr.msk.bf16.vlgmr.msra.gmra.mrb[20].mxu1 %vm557_vm0, %v1802_v6 }
 0x911   : > { %v1858_v8 = vpop.f32.mrb[20].mxu1 }
 0x912   : > { %v1859_v10 = vadd.f32 %v2085_v7, %v1858_v8  ;;  %v2199_v11 = vpop.f32.mrb[21].mxu1 }
 0x913   : > { %v1861_v12 = vpop.f32.mrb[22].mxu1 }
 0x914   : > { %v1864_v13 = vadd.f32 %v1859_v10, %v3056_v0  ;;  %v2200_v14 = vpop.f32.mrb[23].mxu1 }
 0x916   : > { %1865 = vst.msk [vmem:[%s548_s24] sm:$0xff] %vm557_vm0, %v1864_v13 }
 0x917   : > { %2571 = shalt.err (!%p2568_p6)
}
 0x918   : > { %s2572_s7 = scalar_lea.hbm %s3210_s29, 128  ;;  %s2576_s19 = scalar_lea.hbm %s3316_s11, 256 }
 0x919   : > { %p2573_p10 = scmp.ne.s32.totalorder %s3210_s29, %s2572_s7  ;;  %p2577_p8 = scmp.lt.u32.totalorder %s3210_s29, %s3316_s11 }
 0x91a   : > { %p2578_p3 = scmp.lt.u32.totalorder %s2576_s19, %s2572_s7  ;;  %p2580_p13 = scmp.lt.u32.totalorder %s2572_s7, %s3210_s29 }
 0x91b   : > { %p2574_p1 = pnand %p2573_p10, %p3317_p0 }
 0x91c   : > { %p2579_p12 = por %p2578_p3, %p2577_p8 }
 0x91d   : > { %p2575_p9 = pneg %p2574_p1 }
 0x91e   : > { %p2581_p7 = por %p2580_p13, %p2579_p12 }
 0x920   : > { %p2582_p5 = pnand %p2581_p7, %p2575_p9 }
 0x922   : > { %2585 = shalt.err (!%p2582_p5)
}
 0x923   : > { %2225 = dma.vmem_to_hbm [thread:$0]  (%p3317_p0), %s3212_s17, 128, %s3210_s29, %s1867_s5  }
 0x924 PF: > { %s1893_s24 = sand.u32 1, %s2636_s21   ;;  %p3318_p2 = scmp.ne.s32.totalorder %s3299_s20, 0 }
 0x925   : > { %p3319_p4 = scmp.ge.s32.totalorder %s2656_s26, 2  ;;  %s1894_s0 = scalar_lea.sflag [#allocation7], %s1893_s24 }
 0x927   : > { %p2251_p11 = pnand %p3319_p4, %p3318_p2 }
 0x929   : > { %2631 = dma.done.wait (!%p2251_p11), %s1894_s0, 128  }
 0x92a   : > { %2633 = vsyncadd (!%p2251_p11), %s1894_s0, 4294967168  ;;  %s33_s26 = sadd.s32 1, %s2656_s26   ;;  %s3320_s21 = smov %s2640_s22 }
 0x92b   : > { %p30_p6 = scmp.ge.s32.totalorder %s33_s26, 4   ;;  %s3321_s22 = smov %s2644_s23 }
 0x92c   : > { %s3322_s23 = smov %s2942_s3  ;;  %s3323_s24 = smov %s2652_s25 }
 0x92d   : > { %s3324_s25 = smov %s3326_s18  ;;  %32 = sbr.rel (!%p30_p6) target bundleno = 20 (0x14), region = 152 }
 0x934   :  { %1899 = vsyncpa [#allocation6], 1 }
 0x935   :  { %1901 = vsyncpa [#allocation6 + $0x1], 1 }
 0x936   :  { %1902 = vsyncpa [#allocation9], 1 }
 0x937   :  { %1904 = vsyncpa [#allocation9 + $0x1], 1 }
 0x938   :  { %1905 = vsyncpa [#allocation12], 1 }
 0x939   :  { %1906 = vsyncpa [#allocation15], 1 }
 0x93a   :  { %1907 = vsyncpa [#allocation7], 1 }
 0x93b   :  { %1909 = vsyncpa [#allocation7 + $0x1], 1 }

</bundles_post_ra>
